<compile_context>
chip_gen: v6e
topology: v6e:2x2x1
jax: 0.10.0
libtpu: 0.0.40
codegen_flags: <defaults>
</compile_context>

<pallas_src>
import jax
import jax.numpy as jnp
from jax import lax
from jax.experimental import pallas as pl
from jax.experimental.pallas import tpu as pltpu

# ----- small shapes consistent with the module defaults -------------------------------
HEADS = 4
HEAD_DIM = 8
D_MODEL = HEADS * HEAD_DIM      # 32
RANK = 1
L_MAX = 64
NORM_GROUPS = 8
BATCH = 2
SEQ = 16                        # T (<= L_MAX); SSM kernel length L == T
EPS = 1e-5


# ======================================================================================
# Pallas kernel: single grid step, whole batch as a lane-dense (C, N = B*T) slab.
# ======================================================================================
def s4_kernel(x_ref, convsw_ref, rsum_ref, matsn_ref, matsc_ref, wstack_ref,
              vecs_ref, out_ref):
    C, N = x_ref.shape
    f32 = jnp.float32

    # ---- unpack packed parameter slabs (static ref slices, no extra DMAs) ------------
    bg    = vecs_ref[:, 0:1]                  # (2C, 1) gate bias
    ln_w  = vecs_ref[0:C, 1:2]
    ln_b  = vecs_ref[C:2 * C, 1:2]
    gn_w  = vecs_ref[0:C, 2:3]
    gn_b  = vecs_ref[C:2 * C, 2:3]
    b_lc  = vecs_ref[0:C, 3:4]
    u_vec = vecs_ref[C:2 * C, 3:4]            # low-rank U (rank 1)
    v_vec = vecs_ref[0:C, 4:5]                # low-rank V (rank 1)

    s_m1 = matsn_ref[:, 0:N]                  # shift-by(-1) within batch segment
    s_p1 = matsn_ref[:, N:2 * N]              # shift-by(+1) within batch segment
    rb   = matsn_ref[:, 2 * N:3 * N]          # per-batch column averaging (1/T)
    pm   = matsc_ref[:, 0:C]                  # per-group row averaging (1/gs)
    bias = matsc_ref[:, C:C + N]              # pos_bias broadcast to (C, N)

    x = x_ref[...]                            # (C, N)

    # ---- LayerNorm over channels (per column), biased variance, eps = 1e-5 -----------
    mu = jnp.mean(x, axis=0, keepdims=True)
    xc = x - mu
    var = jnp.mean(xc * xc, axis=0, keepdims=True)
    xn = xc * lax.rsqrt(var + EPS) * ln_w + ln_b

    # ---- depthwise SSM long conv (kernel length L = T, non-causal 'same' padding) ----
    # im2col on the MXU:  xn @ Sall stacks all L batch-blocked shifted copies,
    # per-channel tap weights multiply elementwise, Rsum sums over taps.
    sall = convsw_ref[0:N, :]                                    # (N, L*N)
    wflat = convsw_ref[N:N + C, :]                               # (C, L*N)
    xstack = jnp.dot(xn, sall, preferred_element_type=f32)       # (C, L*N)
    y = jnp.dot(xstack * wflat, rsum_ref[...],
                preferred_element_type=f32) + bias               # (C, N)

    # ---- local grouped conv (k=3, padding=1, groups=H) --------------------------------
    # One tall block-diagonal matmul, then two batch-blocked +/-1 shift matmuls.
    wtall = wstack_ref[0:3 * C, :]                               # (3C, C)
    wg = wstack_ref[3 * C:5 * C, :]                              # (2C, C)
    z = jnp.dot(wtall, y, preferred_element_type=f32)            # (3C, N)
    y2 = (jnp.dot(z[0:C, :], s_m1, preferred_element_type=f32)
          + z[C:2 * C, :]
          + jnp.dot(z[2 * C:3 * C, :], s_p1, preferred_element_type=f32)
          + b_lc)

    # ---- gate: 1x1 conv -> chunk(2) -> a * SiLU(b) ------------------------------------
    g2 = jnp.dot(wg, y2, preferred_element_type=f32) + bg        # (2C, N)
    a = g2[0:C, :]
    g = g2[C:2 * C, :]
    y3 = a * (g * jax.nn.sigmoid(g))
    # dropout / dropout1d: identity in eval mode

    # ---- low-rank residual on the layer-normed input (rank 1) -------------------------
    r1 = jnp.sum(v_vec * xn, axis=0, keepdims=True)              # (1, N)
    y4 = y3 + u_vec * r1

    # ---- GroupNorm: centered two-pass stats via group/batch averaging matmuls ---------
    mean_full = jnp.dot(jnp.dot(pm, y4, preferred_element_type=f32), rb,
                        preferred_element_type=f32)              # (C, N), broadcast
    d = y4 - mean_full
    var_full = jnp.dot(jnp.dot(pm, d * d, preferred_element_type=f32), rb,
                       preferred_element_type=f32)
    out = d * lax.rsqrt(var_full + EPS) * gn_w + gn_b
    out_ref[...] = out.astype(out_ref.dtype)


# ======================================================================================
# Glue: batch-independent reparameterizations / packing (pure XLA, no batch compute).
# ======================================================================================
def _derived_inputs(p, B, T):
    H, d, r, G = HEADS, HEAD_DIM, RANK, NORM_GROUPS
    C = H * d
    N = B * T
    L = T                               # SSM kernel length == sequence length
    pad_l = (L - 1) // 2                # non-causal 'same' padding (pad_r = L-1-pad_l)
    assert T <= L_MAX                   # pos_bias tail-extension branch not exercised
    assert r == 1                       # rank-1 residual packed into the vector slab
    f32 = jnp.float32

    # ---- SSM kernel w (C, L): hoisted out of the kernel (batch-independent) ----------
    t = jnp.arange(T, dtype=f32)
    decay = jnp.exp(jnp.clip(p['A'][:, None, :] * t[None, :, None], -50.0, 50.0)) \
        * p['Bssm'][:, None, :]                                           # (H, T, d)
    cfull = jnp.einsum('hdr,hre->hde', p['C1'], p['C2']) + jax.vmap(jnp.diag)(p['C0'])
    Kt = jnp.einsum('htd,hde->hte', decay, cfull, precision='highest')    # (H, T, d)
    w = jnp.transpose(Kt, (0, 2, 1)).reshape(C, L)                        # (C, L)

    # ---- batch-blocked shift matrices (zero across batch-segment boundaries) ---------
    n_idx = jnp.arange(N)
    same_batch = (n_idx[:, None] // T) == (n_idx[None, :] // T)

    def shift_mat(delta):
        # shifted(x, delta)[:, n] = x[:, n + delta] within the batch segment, else 0
        return ((n_idx[:, None] == n_idx[None, :] + delta) & same_batch).astype(f32)

    sall = jnp.concatenate([shift_mat(k - pad_l) for k in range(L)], axis=1)  # (N, L*N)
    wflat = jnp.repeat(w, N, axis=1)                                          # (C, L*N)
    conv_sw = jnp.concatenate([sall, wflat], axis=0)                          # (N+C, L*N)
    rsum = jnp.tile(jnp.eye(N, dtype=f32), (L, 1))                            # (L*N, N)

    # ---- local grouped conv (k=3) as one tall stack of block-diagonal matrices -------
    wblk = jnp.zeros((3, C, C), f32)
    for k in range(3):
        for h in range(H):
            wblk = wblk.at[k, h * d:(h + 1) * d, h * d:(h + 1) * d].set(
                p['W_lc_sn'][h * d:(h + 1) * d, :, k])
    wtall = wblk.reshape(3 * C, C)                                            # (3C, C)
    wstack = jnp.concatenate([wtall, p['Wg']], axis=0)                        # (5C, C)

    # ---- packed square helper matrices ------------------------------------------------
    rb = same_batch.astype(f32) / float(T)                                    # (N, N)
    matsn = jnp.concatenate([shift_mat(-1), shift_mat(+1), rb], axis=1)       # (N, 3N)

    grp = jnp.arange(C) // (C // G)
    pm = (grp[:, None] == grp[None, :]).astype(f32) / float(C // G)           # (C, C)
    pb = p['pos_bias'][:, :T]                                                 # (H, T)
    bias_ct = jnp.broadcast_to(pb[:, None, :], (H, d, T)).reshape(C, T)
    bias_slab = jnp.tile(bias_ct, (1, B))                                     # (C, N)
    matsc = jnp.concatenate([pm, bias_slab], axis=1)                          # (C, C+N)

    # ---- packed per-channel parameter vectors ------------------------------------------
    vecs = jnp.stack([
        p['bg'],
        jnp.concatenate([p['ln_w'], p['ln_b']]),
        jnp.concatenate([p['gn_w'], p['gn_b']]),
        jnp.concatenate([p['b_lc'], p['U'].reshape(C, r)[:, 0]]),
        jnp.concatenate([p['V'].reshape(C, r)[:, 0], jnp.zeros((C,), f32)]),
    ], axis=1)                                                                # (2C, 5)

    return [conv_sw, rsum, matsn, matsc, wstack, vecs]


@jax.jit
def s4_forward_pallas(x_btc, params):
    B, T, C = x_btc.shape
    N = B * T
    # lane-dense channels-first slab: slab[c, b*T + t] = x[b, t, c]
    x_slab = jnp.transpose(x_btc.astype(jnp.float32), (2, 0, 1)).reshape(C, N)
    extra = _derived_inputs(params, B, T)

    def full_spec(a):
        return pl.BlockSpec(a.shape, lambda i: (0,) * a.ndim)

    out_slab = pl.pallas_call(
        s4_kernel,
        out_shape=jax.ShapeDtypeStruct((C, N), jnp.float32),
        grid_spec=pltpu.PrefetchScalarGridSpec(
            num_scalar_prefetch=0,
            grid=(1,),   # whole batch in one step; re-split into a "parallel" axis only if B grows
            in_specs=[full_spec(x_slab)] + [full_spec(a) for a in extra],
            out_specs=pl.BlockSpec((C, N), lambda i: (0, 0)),
        ),
        compiler_params=pltpu.CompilerParams(dimension_semantics=("arbitrary",)),
    )(x_slab, *extra)

    # (C, B*T) -> (B, C, T): same channels-first output as the PyTorch module
    return jnp.transpose(out_slab.reshape(C, B, T), (1, 0, 2))


# ======================================================================================
# Deterministic parameter init (shapes from S4.__init__) and a pure-JAX reference.
# ======================================================================================
def init_params(key):
    H, d, r, C = HEADS, HEAD_DIM, RANK, D_MODEL
    ks = jax.random.split(key, 15)
    A = jnp.tile((-jnp.linspace(1.0, float(d), d, dtype=jnp.float32) / d)[None, :], (H, 1))
    Bssm = jnp.ones((H, d), jnp.float32)
    U = jax.random.normal(ks[0], (H, d, r), jnp.float32) * d ** -0.5
    V = jax.random.normal(ks[1], (H, d, r), jnp.float32) * d ** -0.5
    C1 = jax.random.normal(ks[2], (H, d, r), jnp.float32) * 0.02
    C2 = jax.random.normal(ks[3], (H, r, d), jnp.float32) * 0.02
    # torch inits C0 / pos_bias to zeros; small non-zero values so those paths are exercised
    C0 = jax.random.normal(ks[4], (H, d), jnp.float32) * 0.02
    pos_bias = jax.random.normal(ks[5], (H, L_MAX), jnp.float32) * 0.02
    ln_w = 1.0 + 0.1 * jax.random.normal(ks[6], (C,), jnp.float32)
    ln_b = 0.1 * jax.random.normal(ks[7], (C,), jnp.float32)

    # local_conv = spectral_norm(Conv1d(C, C, 3, groups=H)): weight (C, d, 3) / sigma
    # TODO(synk): torch uses a 1-step power-iteration running estimate of sigma; here we
    # converge a power iteration in glue (deterministic, same sigma for kernel and ref).
    W_lc = jax.random.normal(ks[8], (C, d, 3), jnp.float32) * 0.2
    Wm = W_lc.reshape(C, -1)
    v = jnp.ones((Wm.shape[1],), jnp.float32)
    for _ in range(50):
        u = Wm @ v
        u = u / (jnp.linalg.norm(u) + 1e-12)
        v = Wm.T @ u
        v = v / (jnp.linalg.norm(v) + 1e-12)
    sigma = u @ (Wm @ v)
    W_lc_sn = W_lc / sigma
    b_lc = 0.1 * jax.random.normal(ks[9], (C,), jnp.float32)

    # gate = weight_norm(Conv1d(C, 2C, 1)): effective weight = g * v / ||v||_row
    gate_v = jax.random.normal(ks[10], (2 * C, C), jnp.float32) * 0.2
    gate_g = 0.5 + jnp.abs(jax.random.normal(ks[11], (2 * C,), jnp.float32))
    Wg = gate_g[:, None] * gate_v / jnp.linalg.norm(gate_v, axis=1, keepdims=True)
    bg = 0.1 * jax.random.normal(ks[12], (2 * C,), jnp.float32)

    gn_w = 1.0 + 0.1 * jax.random.normal(ks[13], (C,), jnp.float32)
    gn_b = 0.1 * jax.random.normal(ks[14], (C,), jnp.float32)
    return dict(A=A, Bssm=Bssm, U=U, V=V, C1=C1, C2=C2, C0=C0, pos_bias=pos_bias,
                ln_w=ln_w, ln_b=ln_b, W_lc_sn=W_lc_sn, b_lc=b_lc, Wg=Wg, bg=bg,
                gn_w=gn_w, gn_b=gn_b)


def s4_reference(x_bct, p):
    """Pure-JAX mirror of the PyTorch forward (eval mode), x in (B, C, T)."""
    B, C, T = x_bct.shape
    H, d, r, G = HEADS, HEAD_DIM, RANK, NORM_GROUPS
    mu = jnp.mean(x_bct, axis=1, keepdims=True)
    var = jnp.mean((x_bct - mu) ** 2, axis=1, keepdims=True)
    xn = (x_bct - mu) / jnp.sqrt(var + EPS) * p['ln_w'][None, :, None] + p['ln_b'][None, :, None]

    t = jnp.arange(T, dtype=jnp.float32)
    decay = jnp.exp(jnp.clip(p['A'][:, None, :] * t[None, :, None], -50.0, 50.0)) \
        * p['Bssm'][:, None, :]
    Cfull = jnp.einsum('hdr,hre->hde', p['C1'], p['C2']) + jax.vmap(jnp.diag)(p['C0'])
    Kt = jnp.einsum('htd,hde->hte', decay, Cfull, precision='highest')
    w = jnp.transpose(Kt, (0, 2, 1)).reshape(C, T)
    L = T
    pad_l, pad_r = (L - 1) // 2, L - 1 - (L - 1) // 2
    xp = jnp.pad(xn, ((0, 0), (0, 0), (pad_l, pad_r)))
    y = lax.conv_general_dilated(xp, w[:, None, :], (1,), 'VALID',
                                 dimension_numbers=('NCH', 'OIH', 'NCH'),
                                 feature_group_count=C, precision=lax.Precision.HIGHEST)
    pb = p['pos_bias'][:, :T]
    y = y + jnp.broadcast_to(pb[:, None, :], (H, d, T)).reshape(C, T)[None]
    y2 = lax.conv_general_dilated(y, p['W_lc_sn'], (1,), [(1, 1)],
                                  dimension_numbers=('NCH', 'OIH', 'NCH'),
                                  feature_group_count=H, precision=lax.Precision.HIGHEST)
    y2 = y2 + p['b_lc'][None, :, None]
    z = jnp.einsum('oc,bct->bot', p['Wg'], y2, precision='highest') + p['bg'][None, :, None]
    a, g = z[:, :C], z[:, C:]
    y3 = a * (g * jax.nn.sigmoid(g))
    Uf, Vf = p['U'].reshape(C, r), p['V'].reshape(C, r)
    r1 = jnp.einsum('cr,bct->brt', Vf, xn, precision='highest')
    resid = jnp.einsum('cr,brt->bct', Uf, r1, precision='highest')
    y4 = y3 + resid
    gs = C // G
    yg = y4.reshape(B, G, gs * T)
    mg = jnp.mean(yg, axis=2, keepdims=True)
    vg = jnp.mean((yg - mg) ** 2, axis=2, keepdims=True)
    yn = ((yg - mg) / jnp.sqrt(vg + EPS)).reshape(B, C, T)
    return yn * p['gn_w'][None, :, None] + p['gn_b'][None, :, None]


if __name__ == "__main__":
    key = jax.random.PRNGKey(0)
    pkey, xkey = jax.random.split(key)
    params = init_params(pkey)
    x = jax.random.normal(xkey, (BATCH, SEQ, D_MODEL), jnp.float32)   # (B, T, C)

    out = s4_forward_pallas(x, params)                                # (B, C, T)
    out = jax.block_until_ready(out)
    assert out.shape == (BATCH, D_MODEL, SEQ), out.shape

    ref = s4_reference(jnp.transpose(x, (0, 2, 1)), params)
    err = float(jnp.max(jnp.abs(out - ref)))
    if not err < 1e-2:
        raise AssertionError(f"Pallas output mismatch vs JAX reference (max abs err={err})")
    print("KERNEL_OK")
</pallas_src>

<mosaic_0001>
module attributes {stable_mosaic.version = 11 : i64} {
  func.func @s4_kernel(%arg0: i32, %arg1: memref<32x32xf32, #tpu.memory_space<vmem>>, %arg2: memref<64x512xf32, #tpu.memory_space<vmem>>, %arg3: memref<512x32xf32, #tpu.memory_space<vmem>>, %arg4: memref<32x96xf32, #tpu.memory_space<vmem>>, %arg5: memref<32x64xf32, #tpu.memory_space<vmem>>, %arg6: memref<160x32xf32, #tpu.memory_space<vmem>>, %arg7: memref<64x5xf32, #tpu.memory_space<vmem>>, %arg8: memref<32x32xf32, #tpu.memory_space<vmem>>) attributes {dimension_semantics = [#tpu.dimension_semantics<arbitrary>], iteration_bounds = array<i64: 1>, scalar_prefetch = 0 : i64, scratch_operands = 0 : i64, tpu.core_type = #tpu.core_type<tc>, window_params = [{pipeline_mode = #tpu.pipeline_mode<synchronous>, transform_indices = @transform_0, window_bounds = array<i64: 32, 32>}, {pipeline_mode = #tpu.pipeline_mode<synchronous>, transform_indices = @transform_1, window_bounds = array<i64: 64, 512>}, {pipeline_mode = #tpu.pipeline_mode<synchronous>, transform_indices = @transform_2, window_bounds = array<i64: 512, 32>}, {pipeline_mode = #tpu.pipeline_mode<synchronous>, transform_indices = @transform_3, window_bounds = array<i64: 32, 96>}, {pipeline_mode = #tpu.pipeline_mode<synchronous>, transform_indices = @transform_4, window_bounds = array<i64: 32, 64>}, {pipeline_mode = #tpu.pipeline_mode<synchronous>, transform_indices = @transform_5, window_bounds = array<i64: 160, 32>}, {pipeline_mode = #tpu.pipeline_mode<synchronous>, transform_indices = @transform_6, window_bounds = array<i64: 64, 5>}, {pipeline_mode = #tpu.pipeline_mode<synchronous>, transform_indices = @transform_7, window_bounds = array<i64: 32, 32>}]} {
    %c0 = arith.constant 0 : index
    %c0_0 = arith.constant 0 : index
    %0 = vector.load %arg7[%c0, %c0_0] : memref<64x5xf32, #tpu.memory_space<vmem>>, vector<64x1xf32>
    %c0_1 = arith.constant 0 : index
    %c1 = arith.constant 1 : index
    %1 = vector.load %arg7[%c0_1, %c1] : memref<64x5xf32, #tpu.memory_space<vmem>>, vector<32x1xf32>
    %c32 = arith.constant 32 : index
    %c1_2 = arith.constant 1 : index
    %2 = vector.load %arg7[%c32, %c1_2] : memref<64x5xf32, #tpu.memory_space<vmem>>, vector<32x1xf32>
    %c0_3 = arith.constant 0 : index
    %c2 = arith.constant 2 : index
    %3 = vector.load %arg7[%c0_3, %c2] : memref<64x5xf32, #tpu.memory_space<vmem>>, vector<32x1xf32>
    %c32_4 = arith.constant 32 : index
    %c2_5 = arith.constant 2 : index
    %4 = vector.load %arg7[%c32_4, %c2_5] : memref<64x5xf32, #tpu.memory_space<vmem>>, vector<32x1xf32>
    %c0_6 = arith.constant 0 : index
    %c3 = arith.constant 3 : index
    %5 = vector.load %arg7[%c0_6, %c3] : memref<64x5xf32, #tpu.memory_space<vmem>>, vector<32x1xf32>
    %c32_7 = arith.constant 32 : index
    %c3_8 = arith.constant 3 : index
    %6 = vector.load %arg7[%c32_7, %c3_8] : memref<64x5xf32, #tpu.memory_space<vmem>>, vector<32x1xf32>
    %c0_9 = arith.constant 0 : index
    %c4 = arith.constant 4 : index
    %7 = vector.load %arg7[%c0_9, %c4] : memref<64x5xf32, #tpu.memory_space<vmem>>, vector<32x1xf32>
    %c0_10 = arith.constant 0 : index
    %c0_11 = arith.constant 0 : index
    %8 = vector.load %arg4[%c0_10, %c0_11] : memref<32x96xf32, #tpu.memory_space<vmem>>, vector<32x32xf32>
    %c0_12 = arith.constant 0 : index
    %c32_13 = arith.constant 32 : index
    %9 = vector.load %arg4[%c0_12, %c32_13] : memref<32x96xf32, #tpu.memory_space<vmem>>, vector<32x32xf32>
    %c0_14 = arith.constant 0 : index
    %c64 = arith.constant 64 : index
    %10 = vector.load %arg4[%c0_14, %c64] : memref<32x96xf32, #tpu.memory_space<vmem>>, vector<32x32xf32>
    %c0_15 = arith.constant 0 : index
    %c0_16 = arith.constant 0 : index
    %11 = vector.load %arg5[%c0_15, %c0_16] : memref<32x64xf32, #tpu.memory_space<vmem>>, vector<32x32xf32>
    %c0_17 = arith.constant 0 : index
    %c32_18 = arith.constant 32 : index
    %12 = vector.load %arg5[%c0_17, %c32_18] : memref<32x64xf32, #tpu.memory_space<vmem>>, vector<32x32xf32>
    %c0_19 = arith.constant 0 : index
    %c0_20 = arith.constant 0 : index
    %13 = vector.load %arg1[%c0_19, %c0_20] : memref<32x32xf32, #tpu.memory_space<vmem>>, vector<32x32xf32>
    %cst = arith.constant dense<0.000000e+00> : vector<32xf32>
    %14 = vector.multi_reduction <add>, %13, %cst [0] : vector<32x32xf32> to vector<32xf32>
    %15 = vector.shape_cast %14 : vector<32xf32> to vector<1x32xf32>
    %cst_21 = arith.constant 3.200000e+01 : f32
    %16 = vector.broadcast %cst_21 : f32 to vector<1x32xf32>
    %17 = arith.divf %15, %16 : vector<1x32xf32>
    %18 = vector.broadcast %17 : vector<1x32xf32> to vector<32x32xf32>
    %19 = arith.subf %13, %18 : vector<32x32xf32>
    %20 = arith.mulf %19, %19 : vector<32x32xf32>
    %cst_22 = arith.constant dense<0.000000e+00> : vector<32xf32>
    %21 = vector.multi_reduction <add>, %20, %cst_22 [0] : vector<32x32xf32> to vector<32xf32>
    %22 = vector.shape_cast %21 : vector<32xf32> to vector<1x32xf32>
    %cst_23 = arith.constant 3.200000e+01 : f32
    %23 = vector.broadcast %cst_23 : f32 to vector<1x32xf32>
    %24 = arith.divf %22, %23 : vector<1x32xf32>
    %cst_24 = arith.constant 9.99999974E-6 : f32
    %25 = vector.broadcast %cst_24 : f32 to vector<1x32xf32>
    %26 = arith.addf %24, %25 : vector<1x32xf32>
    %27 = math.rsqrt %26 : vector<1x32xf32>
    %28 = vector.broadcast %27 : vector<1x32xf32> to vector<32x32xf32>
    %29 = arith.mulf %19, %28 : vector<32x32xf32>
    %30 = vector.broadcast %1 : vector<32x1xf32> to vector<32x32xf32>
    %31 = arith.mulf %29, %30 : vector<32x32xf32>
    %32 = vector.broadcast %2 : vector<32x1xf32> to vector<32x32xf32>
    %33 = arith.addf %31, %32 : vector<32x32xf32>
    %c0_25 = arith.constant 0 : index
    %c0_26 = arith.constant 0 : index
    %34 = vector.load %arg2[%c0_25, %c0_26] : memref<64x512xf32, #tpu.memory_space<vmem>>, vector<32x512xf32>
    %c32_27 = arith.constant 32 : index
    %c0_28 = arith.constant 0 : index
    %35 = vector.load %arg2[%c32_27, %c0_28] : memref<64x512xf32, #tpu.memory_space<vmem>>, vector<32x512xf32>
    %cst_29 = arith.constant dense<0.000000e+00> : vector<32x512xf32>
    %36 = tpu.matmul %33, %34, %cst_29 {dimension_numbers = #tpu.dot_dimension_numbers<[1], [0], [0], [1], [0, 0, 1, 1], [], []>} : vector<32x32xf32>, vector<32x512xf32>, vector<32x512xf32> -> vector<32x512xf32>
    %37 = arith.mulf %36, %35 : vector<32x512xf32>
    %c0_30 = arith.constant 0 : index
    %c0_31 = arith.constant 0 : index
    %38 = vector.load %arg3[%c0_30, %c0_31] : memref<512x32xf32, #tpu.memory_space<vmem>>, vector<512x32xf32>
    %cst_32 = arith.constant dense<0.000000e+00> : vector<32x32xf32>
    %39 = tpu.matmul %37, %38, %cst_32 {dimension_numbers = #tpu.dot_dimension_numbers<[1], [0], [0], [1], [0, 0, 1, 1], [], []>} : vector<32x512xf32>, vector<512x32xf32>, vector<32x32xf32> -> vector<32x32xf32>
    %40 = arith.addf %39, %12 : vector<32x32xf32>
    %c0_33 = arith.constant 0 : index
    %c0_34 = arith.constant 0 : index
    %41 = vector.load %arg6[%c0_33, %c0_34] : memref<160x32xf32, #tpu.memory_space<vmem>>, vector<96x32xf32>
    %c96 = arith.constant 96 : index
    %c0_35 = arith.constant 0 : index
    %42 = vector.load %arg6[%c96, %c0_35] : memref<160x32xf32, #tpu.memory_space<vmem>>, vector<64x32xf32>
    %cst_36 = arith.constant dense<0.000000e+00> : vector<96x32xf32>
    %43 = tpu.matmul %41, %40, %cst_36 {dimension_numbers = #tpu.dot_dimension_numbers<[1], [0], [0], [1], [0, 0, 1, 1], [], []>} : vector<96x32xf32>, vector<32x32xf32>, vector<96x32xf32> -> vector<96x32xf32>
    %44 = vector.extract_strided_slice %43 {offsets = [0, 0], sizes = [32, 32], strides = [1, 1]} : vector<96x32xf32> to vector<32x32xf32>
    %cst_37 = arith.constant dense<0.000000e+00> : vector<32x32xf32>
    %45 = tpu.matmul %44, %8, %cst_37 {dimension_numbers = #tpu.dot_dimension_numbers<[1], [0], [0], [1], [0, 0, 1, 1], [], []>} : vector<32x32xf32>, vector<32x32xf32>, vector<32x32xf32> -> vector<32x32xf32>
    %46 = vector.extract_strided_slice %43 {offsets = [32, 0], sizes = [32, 32], strides = [1, 1]} : vector<96x32xf32> to vector<32x32xf32>
    %47 = arith.addf %45, %46 : vector<32x32xf32>
    %48 = vector.extract_strided_slice %43 {offsets = [64, 0], sizes = [32, 32], strides = [1, 1]} : vector<96x32xf32> to vector<32x32xf32>
    %cst_38 = arith.constant dense<0.000000e+00> : vector<32x32xf32>
    %49 = tpu.matmul %48, %9, %cst_38 {dimension_numbers = #tpu.dot_dimension_numbers<[1], [0], [0], [1], [0, 0, 1, 1], [], []>} : vector<32x32xf32>, vector<32x32xf32>, vector<32x32xf32> -> vector<32x32xf32>
    %50 = arith.addf %47, %49 : vector<32x32xf32>
    %51 = vector.broadcast %5 : vector<32x1xf32> to vector<32x32xf32>
    %52 = arith.addf %50, %51 : vector<32x32xf32>
    %cst_39 = arith.constant dense<0.000000e+00> : vector<64x32xf32>
    %53 = tpu.matmul %42, %52, %cst_39 {dimension_numbers = #tpu.dot_dimension_numbers<[1], [0], [0], [1], [0, 0, 1, 1], [], []>} : vector<64x32xf32>, vector<32x32xf32>, vector<64x32xf32> -> vector<64x32xf32>
    %54 = vector.broadcast %0 : vector<64x1xf32> to vector<64x32xf32>
    %55 = arith.addf %53, %54 : vector<64x32xf32>
    %56 = vector.extract_strided_slice %55 {offsets = [0, 0], sizes = [32, 32], strides = [1, 1]} : vector<64x32xf32> to vector<32x32xf32>
    %57 = vector.extract_strided_slice %55 {offsets = [32, 0], sizes = [32, 32], strides = [1, 1]} : vector<64x32xf32> to vector<32x32xf32>
    %58 = arith.negf %57 : vector<32x32xf32>
    %59 = math.exp %58 : vector<32x32xf32>
    %cst_40 = arith.constant 1.000000e+00 : f32
    %60 = vector.broadcast %cst_40 : f32 to vector<32x32xf32>
    %61 = arith.addf %60, %59 : vector<32x32xf32>
    %62 = arith.divf %60, %61 : vector<32x32xf32>
    %63 = arith.mulf %57, %62 : vector<32x32xf32>
    %64 = arith.mulf %56, %63 : vector<32x32xf32>
    %65 = vector.broadcast %7 : vector<32x1xf32> to vector<32x32xf32>
    %66 = arith.mulf %65, %33 : vector<32x32xf32>
    %cst_41 = arith.constant dense<0.000000e+00> : vector<32xf32>
    %67 = vector.multi_reduction <add>, %66, %cst_41 [0] : vector<32x32xf32> to vector<32xf32>
    %68 = vector.shape_cast %67 : vector<32xf32> to vector<1x32xf32>
    %69 = vector.broadcast %6 : vector<32x1xf32> to vector<32x32xf32>
    %70 = vector.broadcast %68 : vector<1x32xf32> to vector<32x32xf32>
    %71 = arith.mulf %69, %70 : vector<32x32xf32>
    %72 = arith.addf %64, %71 : vector<32x32xf32>
    %cst_42 = arith.constant dense<0.000000e+00> : vector<32x32xf32>
    %73 = tpu.matmul %11, %72, %cst_42 {dimension_numbers = #tpu.dot_dimension_numbers<[1], [0], [0], [1], [0, 0, 1, 1], [], []>} : vector<32x32xf32>, vector<32x32xf32>, vector<32x32xf32> -> vector<32x32xf32>
    %cst_43 = arith.constant dense<0.000000e+00> : vector<32x32xf32>
    %74 = tpu.matmul %73, %10, %cst_43 {dimension_numbers = #tpu.dot_dimension_numbers<[1], [0], [0], [1], [0, 0, 1, 1], [], []>} : vector<32x32xf32>, vector<32x32xf32>, vector<32x32xf32> -> vector<32x32xf32>
    %75 = arith.subf %72, %74 : vector<32x32xf32>
    %76 = arith.mulf %75, %75 : vector<32x32xf32>
    %cst_44 = arith.constant dense<0.000000e+00> : vector<32x32xf32>
    %77 = tpu.matmul %11, %76, %cst_44 {dimension_numbers = #tpu.dot_dimension_numbers<[1], [0], [0], [1], [0, 0, 1, 1], [], []>} : vector<32x32xf32>, vector<32x32xf32>, vector<32x32xf32> -> vector<32x32xf32>
    %cst_45 = arith.constant dense<0.000000e+00> : vector<32x32xf32>
    %78 = tpu.matmul %77, %10, %cst_45 {dimension_numbers = #tpu.dot_dimension_numbers<[1], [0], [0], [1], [0, 0, 1, 1], [], []>} : vector<32x32xf32>, vector<32x32xf32>, vector<32x32xf32> -> vector<32x32xf32>
    %cst_46 = arith.constant 9.99999974E-6 : f32
    %79 = vector.broadcast %cst_46 : f32 to vector<32x32xf32>
    %80 = arith.addf %78, %79 : vector<32x32xf32>
    %81 = math.rsqrt %80 : vector<32x32xf32>
    %82 = arith.mulf %75, %81 : vector<32x32xf32>
    %83 = vector.broadcast %3 : vector<32x1xf32> to vector<32x32xf32>
    %84 = arith.mulf %82, %83 : vector<32x32xf32>
    %85 = vector.broadcast %4 : vector<32x1xf32> to vector<32x32xf32>
    %86 = arith.addf %84, %85 : vector<32x32xf32>
    %c0_47 = arith.constant 0 : index
    %c0_48 = arith.constant 0 : index
    %87 = vector.load %arg8[%c0_47, %c0_48] : memref<32x32xf32, #tpu.memory_space<vmem>>, vector<32x32xf32>
    tpu.vector_store %arg8[%c0_47, %c0_48], %86 {strides = array<i32>} : memref<32x32xf32, #tpu.memory_space<vmem>>, vector<32x32xf32>,
    return
  }
  func.func @transform_0(%arg0: i32) -> (i32, i32) {
    %c0_i32 = arith.constant 0 : i32
    %c0_i32_0 = arith.constant 0 : i32
    %c0_i32_1 = arith.constant 0 : i32
    return %c0_i32, %c0_i32_0 : i32, i32
  }
  func.func @transform_1(%arg0: i32) -> (i32, i32) {
    %c0_i32 = arith.constant 0 : i32
    %c0_i32_0 = arith.constant 0 : i32
    %c0_i32_1 = arith.constant 0 : i32
    return %c0_i32, %c0_i32_0 : i32, i32
  }
  func.func @transform_2(%arg0: i32) -> (i32, i32) {
    %c0_i32 = arith.constant 0 : i32
    %c0_i32_0 = arith.constant 0 : i32
    %c0_i32_1 = arith.constant 0 : i32
    return %c0_i32, %c0_i32_0 : i32, i32
  }
  func.func @transform_3(%arg0: i32) -> (i32, i32) {
    %c0_i32 = arith.constant 0 : i32
    %c0_i32_0 = arith.constant 0 : i32
    %c0_i32_1 = arith.constant 0 : i32
    return %c0_i32, %c0_i32_0 : i32, i32
  }
  func.func @transform_4(%arg0: i32) -> (i32, i32) {
    %c0_i32 = arith.constant 0 : i32
    %c0_i32_0 = arith.constant 0 : i32
    %c0_i32_1 = arith.constant 0 : i32
    return %c0_i32, %c0_i32_0 : i32, i32
  }
  func.func @transform_5(%arg0: i32) -> (i32, i32) {
    %c0_i32 = arith.constant 0 : i32
    %c0_i32_0 = arith.constant 0 : i32
    %c0_i32_1 = arith.constant 0 : i32
    return %c0_i32, %c0_i32_0 : i32, i32
  }
  func.func @transform_6(%arg0: i32) -> (i32, i32) {
    %c0_i32 = arith.constant 0 : i32
    %c0_i32_0 = arith.constant 0 : i32
    %c0_i32_1 = arith.constant 0 : i32
    return %c0_i32, %c0_i32_0 : i32, i32
  }
  func.func @transform_7(%arg0: i32) -> (i32, i32) {
    %c0_i32 = arith.constant 0 : i32
    %c0_i32_0 = arith.constant 0 : i32
    %c0_i32_1 = arith.constant 0 : i32
    return %c0_i32, %c0_i32_0 : i32, i32
  }
}

</mosaic_0001>

<bundles_post_ra>
// kernel: s4_forward_pallas.1
= control target key start
LH: loop header
LB: loop body
LE: loop exit
PB: predicated region body
PF: predicated region fallthrough
CT: control target
= control target key end

     0   :  { %v2158_v0 = vmov 1   ;;  %v2159_v5 = vmov 0.0   ;;  %vm46_vm0 = vcmask 261120   ;;  %s2160_s15 = smov 96   ;;  %v2161_v40 = vmov 3   ;;  %s2164_s22 = smov 64   ;;  %s2921_s6 = inlined_call_operand.vmem [shape: f32[64,5], index: 6, kind: input, shape index: {}]   ;;  %s2922_s1 = inlined_call_operand.vmem [shape: f32[64,512], index: 1, kind: input, shape index: {}]   ;;  %s2923_s0 = inlined_call_operand.vmem [shape: f32[32,32], index: 0, kind: input, shape index: {}]   ;;  %s2924_s4 = inlined_call_operand.vmem [shape: f32[32,64], index: 4, kind: input, shape index: {}]   ;;  %s2925_s3 = inlined_call_operand.vmem [shape: f32[32,96], index: 3, kind: input, shape index: {}]   ;;  %s2926_s2 = inlined_call_operand.vmem [shape: f32[512,32], index: 2, kind: input, shape index: {}]   ;;  %s2927_s5 = inlined_call_operand.vmem [shape: f32[160,32], index: 5, kind: input, shape index: {}]   ;;  %s2928_s7 = inlined_call_operand.vmem [shape: f32[32,32], index: 7, kind: output, shape index: {}]  }
   0x1   :  { %2106 = vset.pattern.permute.xlu1 %v2158_v0  ;;  %2105 = vset.pattern.permute.xlu0 %v2158_v0  ;;  %v2209_v1 = vld [vmem:[%s2921_s6 + $0x8] sm:$0xff]  ;;  %v2214_v2 = vld [vmem:[%s2921_s6] sm:$0xff]  ;;  %v2235_v6 = vld [vmem:[%s2921_s6 + $0x30] sm:$0xff]  ;;  %v2162_v51 = vmov 0   ;;  %v2163_v53 = vmov 4  }
   0x2   :  { %97 = vperm.xlu1 %2106, %v2209_v1   ;;  %92 = vperm.xlu0 %2105, %v2214_v2   ;;  %v2221_v3 = vld [vmem:[%s2921_s6 + $0x28] sm:$0xff]  ;;  %v2226_v4 = vld [vmem:[%s2921_s6 + $0x20] sm:$0xff]  ;;  %v153_v8 = vld [vmem:[%s2922_s1 + $0x78] sm:$0xff] }
   0x3   :  { %246 = vmatprep.mubr.f32.mxu0 %v2159_v5  ;;  %335 = vmatprep.mubr.f32.mxu1 %v2159_v5  ;;  %v151_v7 = vld [vmem:[%s2922_s1 + $0x68] sm:$0xff]  ;;  %v2246_v9 = vld [vmem:[%s2921_s6 + $0x10] sm:$0xff]  ;;  %v2251_v10 = vld [vmem:[%s2923_s0] sm:$0xff] }
   0x4   :  { %206 = vmatprep.subr.mxu0 %v151_v7  ;;  %295 = vmatprep.subr.mxu1 %v153_v8  ;;  %v2256_v11 = vld [vmem:[%s2923_s0 + $0x8] sm:$0xff]  ;;  %v150_v12 = vld [vmem:[%s2922_s1 + $0x60] sm:$0xff]  ;;  %v152_v13 = vld [vmem:[%s2922_s1 + $0x70] sm:$0xff]  ;;  %v47_v17 = vsel %vm46_vm0, %v2251_v10, 0.0 }
   0x5   :  { %207 = vmatpush1.msra.mxu0 %v150_v12  ;;  %296 = vmatpush1.msra.mxu1 %v152_v13  ;;  %v147_v14 = vld [vmem:[%s2922_s1 + $0x48] sm:$0xff]  ;;  %v149_v15 = vld [vmem:[%s2922_s1 + $0x58] sm:$0xff]  ;;  %v146_v16 = vld [vmem:[%s2922_s1 + $0x40] sm:$0xff]  ;;  %v48_v18 = vsel %vm46_vm0, %v2256_v11, 0.0 }
   0x6   :  { %121 = vperm.xlu1 %2106, %v2221_v3   ;;  %116 = vperm.xlu0 %2105, %v2226_v4   ;;  %v148_v19 = vld [vmem:[%s2922_s1 + $0x50] sm:$0xff]  ;;  %v143_v20 = vld [vmem:[%s2922_s1 + $0x28] sm:$0xff]  ;;  %v145_v21 = vld [vmem:[%s2922_s1 + $0x38] sm:$0xff]  ;;  %v49_v27 = vadd.f32 %v48_v18, %v47_v17 }
   0x7   :  { %v2291_v22 = vld [vmem:[%s2921_s6 + $0x38] sm:$0xff]  ;;  %v2301_v24 = vld [vmem:[%s2923_s0 + $0x10] sm:$0xff]  ;;  %208 = vmatprep.subr.mxu0 %v147_v14  ;;  %297 = vmatprep.subr.mxu1 %v149_v15  ;;  %v142_v25 = vld [vmem:[%s2922_s1 + $0x20] sm:$0xff] }
   0x8   :  { %v2296_v23 = vld [vmem:[%s2921_s6 + $0x18] sm:$0xff]  ;;  %209 = vmatpush1.msra.mxu0 %v146_v16  ;;  %298 = vmatpush1.msra.mxu1 %v148_v19  ;;  %v144_v26 = vld [vmem:[%s2922_s1 + $0x30] sm:$0xff]  ;;  %v139_v28 = vld [vmem:[%s2922_s1 + $0x8] sm:$0xff]  ;;  %v50_v30 = vsel %vm46_vm0, %v2301_v24, 0.0 }
   0x9   :  { %210 = vmatprep.subr.mxu0 %v143_v20  ;;  %299 = vmatprep.subr.mxu1 %v145_v21  ;;  %v141_v29 = vld [vmem:[%s2922_s1 + $0x18] sm:$0xff]  ;;  %v138_v31 = vld [vmem:[%s2922_s1] sm:$0xff]  ;;  %v140_v32 = vld [vmem:[%s2922_s1 + $0x10] sm:$0xff]  ;;  %v51_v36 = vadd.f32 %v50_v30, %v49_v27 }
   0xa   :  { %126 = vperm.xlu1 %2106, %v2235_v6   ;;  %102 = vperm.xlu0 %2105, %v2246_v9   ;;  %v41_v33 = vld [vmem:[%s2924_s4 + $0x18] sm:$0xff]  ;;  %v40_v34 = vld [vmem:[%s2924_s4 + $0x10] sm:$0xff]  ;;  %v39_v38 = vld [vmem:[%s2924_s4 + $0x8] sm:$0xff] }
   0xb   :  { %v45_v35 = vld [vmem:[%s2923_s0 + $0x18] sm:$0xff]  ;;  %211 = vmatpush1.msra.mxu0 %v142_v25  ;;  %300 = vmatpush1.msra.mxu1 %v144_v26  ;;  %v2341_v39 = vld [vmem:[%s2924_s4] sm:$0xff]  ;;  %v2354_v43 = vld [vmem:[%s2925_s3 + $0x10] sm:$0xff] }
   0xc   :  { %212 = vmatprep.subr.mxu0 %v139_v28  ;;  %301 = vmatprep.subr.mxu1 %v141_v29  ;;  %v52_v37 = vsel %vm46_vm0, %v45_v35, 0.0  ;;  %v2349_v42 = vld [vmem:[%s2925_s3 + $0x18] sm:$0xff]  ;;  %v2361_v45 = vld [vmem:[%s2925_s3 + $0x8] sm:$0xff]  ;;  %v2366_v46 = vld [vmem:[%s2925_s3] sm:$0xff] }
   0xd   :  { %213 = vmatpush1.msra.mxu0 %v138_v31  ;;  %302 = vmatpush1.msra.mxu1 %v140_v32  ;;  %v53_v41 = vadd.f32 %v52_v37, %v51_v36  ;;  %v407_v13 = vld [vmem:[%s2926_s2 + $0xf8] sm:$0xff]  ;;  %v406_v30 = vld [vmem:[%s2926_s2 + $0xf0] sm:$0xff] }
   0xe   :  { %131 = vperm.xlu1 %2106, %v2291_v22   ;;  %107 = vperm.xlu0 %2105, %v2296_v23   ;;  %v423_v29 = vld [vmem:[%s2926_s2 + $0x178] sm:$0xff]  ;;  %v438_v31 = vld [vmem:[%s2926_s2 + $0x1f0] sm:$0xff] }
   0xf   :  { %v54_v44 = vrot.slane %v53_v41, 4  ;;  %1795 = vmatprep.subr.mxu0 %v407_v13  ;;  %v390_v37 = vld [vmem:[%s2926_s2 + $0x70] sm:$0xff] }
  0x11   :  { %v55_v47 = vadd.f32 %v54_v44, %v53_v41  ;;  %v437_v41 = vld [vmem:[%s2926_s2 + $0x1e8] sm:$0xff] }
  0x12   :  { %450 = vrot.lane.b32.xlu0 %v41_v33, %s2160_s15  ;;  %448 = vrot.lane.b32.xlu1 %v40_v34, %s2160_s15 }
  0x13   :  { %2108 = vset.pattern.permute.xlu1 %v2161_v40  ;;  %2107 = vset.pattern.permute.xlu0 %v2161_v40  ;;  %v56_v48 = vrot.slane %v55_v47, 2 }
  0x15   :  { %v57_v49 = vadd.f32 %v56_v48, %v55_v47 }
  0x16   :  { %446 = vrot.lane.b32.xlu0 %v39_v38, %s2160_s15  ;;  %444 = vrot.lane.b32.xlu1 %v2341_v39, %s2160_s15  ;;  %v422_v38 = vld [vmem:[%s2926_s2 + $0x170] sm:$0xff] }
  0x17   :  { %v58_v50 = vrot.slane %v57_v49, 1 }
  0x19   :  { %v59_v52 = vadd.f32 %v58_v50, %v57_v49  ;;  %v389_v50 = vld [vmem:[%s2926_s2 + $0x68] sm:$0xff] }
  0x1a   :  { %914 = vrot.lane.b32.xlu0 %v2349_v42, %s2160_s15  ;;  %912 = vrot.lane.b32.xlu1 %v2354_v43, %s2160_s15 }
  0x1b   :  { %v61_v54 = vmul.f32 0.03125, %v59_v52  ;;  %v404_v52 = vld [vmem:[%s2926_s2 + $0xe0] sm:$0xff] }
  0x1d   :  { %v62_v55 = vsub.f32 %v2251_v10, %v61_v54  ;;  %v63_v56 = vsub.f32 %v2256_v11, %v61_v54  ;;  %v64_v57 = vsub.f32 %v2301_v24, %v61_v54  ;;  %v65_v60 = vsub.f32 %v45_v35, %v61_v54 }
  0x1e   :  { %910 = vrot.lane.b32.xlu0 %v2361_v45, %s2160_s15  ;;  %908 = vrot.lane.b32.xlu1 %v2366_v46, %s2160_s15 }
  0x1f   :  { %v66_v58 = vmul.f32 %v62_v55, %v62_v55  ;;  %v67_v59 = vmul.f32 %v63_v56, %v63_v56  ;;  %v68_v61 = vmul.f32 %v64_v57, %v64_v57  ;;  %v69_v7 = vmul.f32 %v65_v60, %v65_v60 }
  0x21   :  { %v70_v62 = vsel %vm46_vm0, %v66_v58, 0.0  ;;  %v71_v63 = vsel %vm46_vm0, %v67_v59, 0.0  ;;  %v73_v8 = vsel %vm46_vm0, %v68_v61, 0.0  ;;  %v75_v10 = vsel %vm46_vm0, %v69_v7, 0.0  ;;  %v420_v58 = vld [vmem:[%s2926_s2 + $0x160] sm:$0xff]  ;;  %v403_v59 = vld [vmem:[%s2926_s2 + $0xd8] sm:$0xff] }
  0x22   :  { %1034 = vperm.xlu0 %2107, %v2296_v23   ;;  %1030 = vperm.xlu1 %2108, %v2246_v9   ;;  %v72_v0 = vadd.f32 %v71_v63, %v70_v62  ;;  %v419_v61 = vld [vmem:[%s2926_s2 + $0x158] sm:$0xff]  ;;  %v434_v7 = vld [vmem:[%s2926_s2 + $0x1d0] sm:$0xff] }
  0x26   :  { %1022 = vperm.xlu0 %2107, %v2214_v2   ;;  %1026 = vperm.xlu1 %2108, %v2209_v1  }
  0x2a   :  { %2110 = vset.pattern.permute.xlu0 %v2162_v51  ;;  %2109 = vset.pattern.permute.xlu1 %v2162_v51 }
  0x2b   :  { %1066 = vperm.xlu0 %2110, %v2235_v6   ;;  %1070 = vperm.xlu1 %2109, %v2291_v22  }
  0x2f   :  { %2111 = vset.pattern.permute.xlu0 %v2163_v53  ;;  %1062 = vperm.xlu1 %2109, %v2221_v3  }
  0x30   :  { %1235 = vperm.xlu0 %2111, %v2214_v2  }
  0x33   :  { %1058 = vperm.xlu1 %2109, %v2226_v4  }
  0x34   :  { %1247 = vperm.xlu0 %2111, %v2296_v23  }
  0x37   :  { %2112 = vset.pattern.permute.xlu1 %v2163_v53  ;;  %v436_v53 = vld [vmem:[%s2926_s2 + $0x1e0] sm:$0xff] }
  0x38   :  { %1239 = vperm.xlu1 %2112, %v2209_v1   ;;  %2114 = vset.pattern.permute.xlu0 %v2162_v51 }
  0x39   :  { %1050 = vperm.xlu0 %2114, %v2246_v9  }
  0x3c   :  { %1243 = vperm.xlu1 %2112, %v2246_v9   ;;  %v74_v9 = vadd.f32 %v73_v8, %v72_v0  ;;  %v402_v0 = vld [vmem:[%s2926_s2 + $0xd0] sm:$0xff] }
  0x3d   :  { %2117 = vset.pattern.permute.xlu0 %v2161_v40  ;;  %v386_v8 = vld [vmem:[%s2926_s2 + $0x50] sm:$0xff] }
  0x3e   :  { %1276 = vperm.xlu0 %2117, %v2235_v6   ;;  %v76_v11 = vadd.f32 %v75_v10, %v74_v9  ;;  %v418_v9 = vld [vmem:[%s2926_s2 + $0x150] sm:$0xff]  ;;  %v401_v10 = vld [vmem:[%s2926_s2 + $0xc8] sm:$0xff] }
  0x40   :  { %2113 = vset.pattern.permute.xlu1 %v2162_v51  ;;  %v77_v6 = vrot.slane %v76_v11, 4 }
  0x41   :  { %1054 = vperm.xlu1 %2113, %v2296_v23  }
  0x42   :  { %1268 = vperm.xlu0 %2117, %v2226_v4   ;;  %v78_v12 = vadd.f32 %v77_v6, %v76_v11  ;;  %v439_v4 = vld [vmem:[%s2926_s2 + $0x1f8] sm:$0xff]  ;;  %v433_v11 = vld [vmem:[%s2926_s2 + $0x1c8] sm:$0xff] }
  0x43   :  { %1839 = vmatprep.subr.mxu1 %v439_v4  ;;  %v385_v6 = vld [vmem:[%s2926_s2 + $0x48] sm:$0xff] }
  0x44   :  { %v79_v14 = vrot.slane %v78_v12, 2 }
  0x45   :  { %2115 = vset.pattern.permute.xlu1 %v2161_v40 }
  0x46   :  { %1280 = vperm.xlu1 %2115, %v2291_v22   ;;  %1388 = vrot.lane.b32.xlu0 %v2354_v43, %s2164_s22 }
  0x4a   :  { %2116 = vset.pattern.permute.xlu1 %v2162_v51  ;;  %v421_v51 = vld [vmem:[%s2926_s2 + $0x168] sm:$0xff]  ;;  %1384 = vrot.lane.b32.xlu0 %v2366_v46, %s2164_s22 }
  0x4b   :  { %1046 = vperm.xlu1 %2116, %v2209_v1   ;;  %v80_v1 = vadd.f32 %v79_v14, %v78_v12  ;;  %v417_v12 = vld [vmem:[%s2926_s2 + $0x148] sm:$0xff]  ;;  %v400_v14 = vld [vmem:[%s2926_s2 + $0xc0] sm:$0xff] }
  0x4d   :  { %v81_v15 = vrot.slane %v80_v1, 1 }
  0x4f   :  { %1042 = vperm.xlu1 %2116, %v2214_v2   ;;  %v82_v16 = vadd.f32 %v81_v15, %v80_v1  ;;  %v432_v1 = vld [vmem:[%s2926_s2 + $0x1c0] sm:$0xff] }
  0x50   :  { %v384_v15 = vld [vmem:[%s2926_s2 + $0x40] sm:$0xff] }
  0x51   :  { %v83_v2 = vmul.f32 0.03125, %v82_v16  ;;  %v416_v16 = vld [vmem:[%s2926_s2 + $0x140] sm:$0xff] }
  0x53   :  { %2118 = vset.pattern.permute.xlu1 %v2161_v40  ;;  %v84_v17 = vadd.f32 1e-05, %v83_v2  ;;  %v405_v40 = vld [vmem:[%s2926_s2 + $0xe8] sm:$0xff]  ;;  %v399_v2 = vld [vmem:[%s2926_s2 + $0xb8] sm:$0xff] }
  0x54   :  { %1272 = vperm.xlu1 %2118, %v2221_v3   ;;  %v391_v3 = vld [vmem:[%s2926_s2 + $0x78] sm:$0xff] }
  0x55   :  { %2121 = vrsqrt.f32 %v84_v17  ;;  %v431_v17 = vld [vmem:[%s2926_s2 + $0x1b8] sm:$0xff] }
  0x58   :  { %1390 = vrot.lane.b32.xlu1 %v2349_v42, %s2164_s22 }
  0x5c   :  { %1386 = vrot.lane.b32.xlu1 %v2361_v45, %s2164_s22 }
  0x62   :  { %v2122_v18 = vpop.eup %2121 }
  0x63   :  { %v86_v19 = vmul.f32 %v2122_v18, %v62_v55  ;;  %v87_v22 = vmul.f32 %v2122_v18, %v63_v56  ;;  %v88_v28 = vmul.f32 %v2122_v18, %v64_v57  ;;  %v89_v36 = vmul.f32 %v2122_v18, %v65_v60  ;;  %v388_v57 = vld [vmem:[%s2926_s2 + $0x60] sm:$0xff]  ;;  %v387_v60 = vld [vmem:[%s2926_s2 + $0x58] sm:$0xff] }
  0x64   :  { %v383_v18 = vld [vmem:[%s2926_s2 + $0x38] sm:$0xff] }
  0x7d   :  { %v98_v20 = vpop.permute.xlu1 %97  ;;  %v93_v21 = vpop.permute.xlu0 %92 }
  0x7e   :  { %v110_v23 = vmul.f32 %v93_v21, %v86_v19  ;;  %v111_v26 = vmul.f32 %v98_v20, %v87_v22  ;;  %v415_v19 = vld [vmem:[%s2926_s2 + $0x138] sm:$0xff]  ;;  %v398_v22 = vld [vmem:[%s2926_s2 + $0xb0] sm:$0xff] }
  0x81   :  { %v122_v24 = vpop.permute.xlu1 %121  ;;  %v117_v25 = vpop.permute.xlu0 %116 }
  0x82   :  { %v2406_v27 = vadd.f32 %v117_v25, %v110_v23  ;;  %v2426_v34 = vadd.f32 %v122_v24, %v111_v26  ;;  %v430_v23 = vld [vmem:[%s2926_s2 + $0x1b0] sm:$0xff]  ;;  %v397_v26 = vld [vmem:[%s2926_s2 + $0xa8] sm:$0xff] }
  0x83   :  { %v382_v24 = vld [vmem:[%s2926_s2 + $0x30] sm:$0xff] }
  0x84   :  { %1739 = vmatmul.mubr.msk.f32.vlgmr.msra.gmra.mxu0 %vm46_vm0, %v2406_v27  ;;  %1743 = vmatmul.mubr.msk.f32.vlgmr.msra.gmra.mxu1 %vm46_vm0, %v2406_v27  ;;  %v414_v25 = vld [vmem:[%s2926_s2 + $0x130] sm:$0xff] }
  0x85   :  { %v127_v32 = vpop.permute.xlu1 %126  ;;  %v103_v33 = vpop.permute.xlu0 %102  ;;  %252 = vmatprep.mubr.f32.mxu0 %v2159_v5  ;;  %341 = vmatprep.mubr.f32.mxu1 %v2159_v5 }
  0x86   :  { %v112_v35 = vmul.f32 %v103_v33, %v88_v28  ;;  %1796 = vmatpush3.msra.mxu0 %v391_v3  ;;  %1840 = vmatpush3.msra.mxu1 %v423_v29  ;;  %v429_v28 = vld [vmem:[%s2926_s2 + $0x1a8] sm:$0xff]  ;;  %v428_v33 = vld [vmem:[%s2926_s2 + $0x1a0] sm:$0xff] }
  0x87   :  { %1797 = vmatprep.subr.mxu0 %v406_v30  ;;  %1841 = vmatprep.subr.mxu1 %v438_v31  ;;  %v381_v3 = vld [vmem:[%s2926_s2 + $0x28] sm:$0xff] }
  0x88   :  { %1740 = vmatmul.mubr.msk.f32.gmra.mxu0 %vm46_vm0, %v2426_v34  ;;  %1744 = vmatmul.mubr.msk.f32.gmra.mxu1 %vm46_vm0, %v2426_v34  ;;  %v2446_v48 = vadd.f32 %v127_v32, %v112_v35  ;;  %v413_v29 = vld [vmem:[%s2926_s2 + $0x128] sm:$0xff]  ;;  %v396_v32 = vld [vmem:[%s2926_s2 + $0xa0] sm:$0xff] }
  0x89   :  { %v132_v44 = vpop.permute.xlu1 %131  ;;  %v108_v47 = vpop.permute.xlu0 %107  ;;  %258 = vmatprep.mubr.f32.mxu0 %v2159_v5  ;;  %347 = vmatprep.mubr.f32.mxu1 %v2159_v5  ;;  %v380_v35 = vld [vmem:[%s2926_s2 + $0x20] sm:$0xff] }
  0x8a   :  { %v113_v49 = vmul.f32 %v108_v47, %v89_v36  ;;  %1798 = vmatpush3.msra.mxu0 %v390_v37  ;;  %1842 = vmatpush3.msra.mxu1 %v422_v38  ;;  %v412_v36 = vld [vmem:[%s2926_s2 + $0x120] sm:$0xff]  ;;  %v395_v37 = vld [vmem:[%s2926_s2 + $0x98] sm:$0xff] }
  0x8b   :  { %1799 = vmatprep.subr.mxu0 %v405_v40  ;;  %1843 = vmatprep.subr.mxu1 %v437_v41  ;;  %v427_v38 = vld [vmem:[%s2926_s2 + $0x198] sm:$0xff] }
  0x8c   :  { %1741 = vmatmul.mubr.msk.f32.gmra.mxu0 %vm46_vm0, %v2446_v48  ;;  %1745 = vmatmul.mubr.msk.f32.gmra.mxu1 %vm46_vm0, %v2446_v48  ;;  %v2470_v56 = vadd.f32 %v132_v44, %v113_v49  ;;  %v379_v40 = vld [vmem:[%s2926_s2 + $0x18] sm:$0xff] }
  0x8d   :  { %v2464_v54 = vpop.permute.xlu0 %450  ;;  %v2466_v55 = vpop.permute.xlu1 %448  ;;  %264 = vmatprep.mubr.f32.mxu0 %v2159_v5  ;;  %353 = vmatprep.mubr.f32.mxu1 %v2159_v5  ;;  %v435_v5 = vld [vmem:[%s2926_s2 + $0x1d8] sm:$0xff] }
  0x8e   :  { %1800 = vmatpush3.msra.mxu0 %v389_v50  ;;  %1844 = vmatpush3.msra.mxu1 %v421_v51  ;;  %v411_v41 = vld [vmem:[%s2926_s2 + $0x118] sm:$0xff] }
  0x8f   :  { %1801 = vmatprep.subr.mxu0 %v404_v52  ;;  %1845 = vmatprep.subr.mxu1 %v436_v53 }
  0x90   :  { %1742 = vmatmul.mubr.msk.f32.gmra.mxu0 %vm46_vm0, %v2470_v56  ;;  %1746 = vmatmul.mubr.msk.f32.gmra.mxu1 %vm46_vm0, %v2470_v56 }
  0x91   :  { %v2494_v62 = vpop.permute.xlu0 %446  ;;  %v2496_v63 = vpop.permute.xlu1 %444  ;;  %1802 = vmatpush3.msra.mxu0 %v388_v57  ;;  %1846 = vmatpush3.msra.mxu1 %v420_v58 }
  0x92   :  { %1803 = vmatprep.subr.mxu0 %v403_v59  ;;  %1847 = vmatprep.subr.mxu1 %v435_v5 }
  0x93   :  { %1804 = vmatpush3.msra.mxu0 %v387_v60  ;;  %1848 = vmatpush3.msra.mxu1 %v419_v61 }
  0x94   :  { %1805 = vmatprep.subr.mxu0 %v402_v0  ;;  %1849 = vmatprep.subr.mxu1 %v434_v7 }
  0x95   :  { %v2522_v13 = vpop.permute.xlu0 %914  ;;  %v2524_v4 = vpop.permute.xlu1 %912  ;;  %1806 = vmatpush3.msra.mxu0 %v386_v8  ;;  %1850 = vmatpush3.msra.mxu1 %v418_v9 }
  0x96   :  { %1807 = vmatprep.subr.mxu0 %v401_v10  ;;  %1851 = vmatprep.subr.mxu1 %v433_v11 }
  0x97   :  { %1808 = vmatpush3.msra.mxu0 %v385_v6  ;;  %1852 = vmatpush3.msra.mxu1 %v417_v12  ;;  %v426_v12 = vld [vmem:[%s2926_s2 + $0x190] sm:$0xff] }
  0x98   :  { %1809 = vmatprep.subr.mxu0 %v400_v14  ;;  %1853 = vmatprep.subr.mxu1 %v432_v1  ;;  %v393_v14 = vld [vmem:[%s2926_s2 + $0x88] sm:$0xff] }
  0x99   :  { %v2550_v20 = vpop.permute.xlu0 %910  ;;  %v2552_v21 = vpop.permute.xlu1 %908  ;;  %1810 = vmatpush3.msra.mxu0 %v384_v15  ;;  %1854 = vmatpush3.msra.mxu1 %v416_v16  ;;  %v425_v1 = vld [vmem:[%s2926_s2 + $0x188] sm:$0xff] }
  0x9a   :  { %1811 = vmatprep.subr.mxu0 %v399_v2  ;;  %1855 = vmatprep.subr.mxu1 %v431_v17  ;;  %v377_v15 = vld [vmem:[%s2926_s2 + $0x8] sm:$0xff]  ;;  %v392_v2 = vld [vmem:[%s2926_s2 + $0x80] sm:$0xff] }
  0x9b   :  { %1812 = vmatpush3.msra.mxu0 %v383_v18  ;;  %1856 = vmatpush3.msra.mxu1 %v415_v19  ;;  %v409_v16 = vld [vmem:[%s2926_s2 + $0x108] sm:$0xff]  ;;  %v424_v17 = vld [vmem:[%s2926_s2 + $0x180] sm:$0xff] }
  0x9c   :  { %1813 = vmatprep.subr.mxu0 %v398_v22  ;;  %1857 = vmatprep.subr.mxu1 %v430_v23  ;;  %v376_v18 = vld [vmem:[%s2926_s2] sm:$0xff] }
  0x9d   :  { %v2578_v30 = vpop.permute.xlu0 %1034  ;;  %v2580_v31 = vpop.permute.xlu1 %1030  ;;  %1814 = vmatpush3.msra.mxu0 %v382_v24  ;;  %1858 = vmatpush3.msra.mxu1 %v414_v25  ;;  %v408_v19 = vld [vmem:[%s2926_s2 + $0x100] sm:$0xff]  ;;  %v155_v24 = vld [vmem:[%s2922_s1 + $0x88] sm:$0xff]  ;;  %v157_v25 = vld [vmem:[%s2922_s1 + $0x98] sm:$0xff] }
  0x9e   :  { %1815 = vmatprep.subr.mxu0 %v397_v26  ;;  %1859 = vmatprep.subr.mxu1 %v429_v28  ;;  %v154_v26 = vld [vmem:[%s2922_s1 + $0x80] sm:$0xff]  ;;  %v156_v28 = vld [vmem:[%s2922_s1 + $0x90] sm:$0xff] }
  0x9f   :  { %1816 = vmatpush3.msra.mxu0 %v381_v3  ;;  %1860 = vmatpush3.msra.mxu1 %v413_v29 }
  0xa0   :  { %1817 = vmatprep.subr.mxu0 %v396_v32  ;;  %1861 = vmatprep.subr.mxu1 %v428_v33 }
  0xa1   :  { %v2606_v44 = vpop.permute.xlu1 %1026  ;;  %1818 = vmatpush3.msra.mxu0 %v380_v35  ;;  %1862 = vmatpush3.msra.mxu1 %v412_v36  ;;  %v2608_v47 = vpop.permute.xlu0 %1022 }
  0xa2   :  { %1819 = vmatprep.subr.mxu0 %v395_v37  ;;  %1863 = vmatprep.subr.mxu1 %v427_v38 }
  0xa3   :  { %1820 = vmatpush3.msra.mxu0 %v379_v40  ;;  %1864 = vmatpush3.msra.mxu1 %v411_v41  ;;  %v159_v40 = vld [vmem:[%s2922_s1 + $0xa8] sm:$0xff]  ;;  %v161_v41 = vld [vmem:[%s2922_s1 + $0xb8] sm:$0xff] }
  0xa4   :  { %1865 = vmatprep.subr.mxu1 %v426_v12 }
  0xa6   :  { %v2610_v49 = vpop.permute.xlu1 %1070  ;;  %v2612_v50 = vpop.permute.xlu0 %1066 }
  0xaa   :  { %v2614_v51 = vpop.permute.xlu1 %1062 }
  0xab   :  { %v1236_v53 = vpop.permute.xlu0 %1235 }
  0xac   :  { %v1250_v57 = vmul.f32 %v1236_v53, %v2406_v27  ;;  %v158_v53 = vld [vmem:[%s2922_s1 + $0xa0] sm:$0xff] }
  0xae   :  { %v2616_v52 = vpop.permute.xlu1 %1058  ;;  %v1254_v60 = vsel %vm46_vm0, %v1250_v57, 0.0  ;;  %v160_v57 = vld [vmem:[%s2922_s1 + $0xb0] sm:$0xff] }
  0xaf   :  { %v1248_v5 = vpop.permute.xlu0 %1247 }
  0xb0   :  { %v1253_v8 = vmul.f32 %v1248_v5, %v2470_v56  ;;  %v410_v56 = vld [vmem:[%s2926_s2 + $0x110] sm:$0xff] }
  0xb1   :  { %1866 = vmatpush3.msra.mxu1 %v410_v56 }
  0xb2   :  { %v1259_v6 = vsel %vm46_vm0, %v1253_v8, 0.0  ;;  %1867 = vmatprep.subr.mxu1 %v425_v1 }
  0xb3   :  { %v1240_v58 = vpop.permute.xlu1 %1239  ;;  %1868 = vmatpush3.msra.mxu1 %v409_v16 }
  0xb4   :  { %v1251_v59 = vmul.f32 %v1240_v58, %v2426_v34  ;;  %v394_v34 = vld [vmem:[%s2926_s2 + $0x90] sm:$0xff]  ;;  %1869 = vmatprep.subr.mxu1 %v424_v17  ;;  %v169_v17 = vld [vmem:[%s2922_s1 + $0xf8] sm:$0xff] }
  0xb5   :  { %1821 = vmatprep.subr.mxu0 %v394_v34  ;;  %1870 = vmatpush3.msra.mxu1 %v408_v19  ;;  %v168_v19 = vld [vmem:[%s2922_s1 + $0xf0] sm:$0xff] }
  0xb6   :  { %v1255_v61 = vsel %vm46_vm0, %v1251_v59, 0.0  ;;  %1985 = vmatprep.subr.mxu1 %v2349_v42 }
  0xb7   :  { %v1256_v0 = vadd.f32 %v1255_v61, %v1254_v60  ;;  %v1244_v7 = vpop.permute.xlu1 %1243 }
  0xb8   :  { %v1252_v9 = vmul.f32 %v1244_v7, %v2446_v48  ;;  %v378_v48 = vld [vmem:[%s2926_s2 + $0x10] sm:$0xff] }
  0xb9   :  { %1822 = vmatpush3.msra.mxu0 %v378_v48 }
  0xba   :  { %v1257_v10 = vsel %vm46_vm0, %v1252_v9, 0.0  ;;  %1823 = vmatprep.subr.mxu0 %v393_v14  ;;  %v163_v9 = vld [vmem:[%s2922_s1 + $0xc8] sm:$0xff] }
  0xbb   :  { %v1258_v11 = vadd.f32 %v1257_v10, %v1256_v0  ;;  %1824 = vmatpush3.msra.mxu0 %v377_v15  ;;  %v165_v10 = vld [vmem:[%s2922_s1 + $0xd8] sm:$0xff] }
  0xbc   :  { %1825 = vmatprep.subr.mxu0 %v392_v2  ;;  %v167_v2 = vld [vmem:[%s2922_s1 + $0xe8] sm:$0xff] }
  0xbd   :  { %v2626_v27 = vadd.f32 %v1259_v6, %v1258_v11  ;;  %1826 = vmatpush3.msra.mxu0 %v376_v18  ;;  %v162_v11 = vld [vmem:[%s2922_s1 + $0xc0] sm:$0xff]  ;;  %v164_v6 = vld [vmem:[%s2922_s1 + $0xd0] sm:$0xff] }
  0xbe   :  { %v166_v18 = vld [vmem:[%s2922_s1 + $0xe0] sm:$0xff] }
 0x144   :  { %v248_v22 = vpop.f32.mrf.mxu0  ;;  %v337_v23 = vpop.f32.mrf.mxu1 }
 0x145   :  { %v360_v35 = vmul.f32 %v248_v22, %v154_v26  ;;  %v362_v36 = vmul.f32 %v337_v23, %v156_v28 }
 0x146   :  { %v250_v3 = vpop.f32.mrf.mxu0  ;;  %v339_v29 = vpop.f32.mrf.mxu1 }
 0x147   :  { %v361_v32 = vmul.f32 %v250_v3, %v155_v24  ;;  %v363_v33 = vmul.f32 %v339_v29, %v157_v25  ;;  %v626_v3 = vld [vmem:[%s2927_s5] sm:$0xff] }
 0x148   :  { %v254_v37 = vpop.f32.mrf.mxu0  ;;  %v343_v38 = vpop.f32.mrf.mxu1 }
 0x149   :  { %520 = vmatprep.mubr.f32.mxu0 %v361_v32  ;;  %605 = vmatprep.mubr.f32.mxu1 %v363_v33  ;;  %v364_v61 = vmul.f32 %v254_v37, %v158_v53  ;;  %v366_v0 = vmul.f32 %v343_v38, %v160_v57 }
 0x14a   :  { %v256_v58 = vpop.f32.mrf.mxu0  ;;  %v345_v59 = vpop.f32.mrf.mxu1  ;;  %521 = vmatmul.mubr.f32.vlgmr.msra.gmra.mxu0 %v360_v35  ;;  %606 = vmatmul.mubr.f32.vlgmr.msra.gmra.mxu1 %v362_v36 }
 0x14b   :  { %v365_v5 = vmul.f32 %v256_v58, %v159_v40  ;;  %v367_v60 = vmul.f32 %v345_v59, %v161_v41  ;;  %1986 = vmatpush3.msra.mxu1 %v2349_v42 }
 0x14c   :  { %v260_v7 = vpop.f32.mrf.mxu0  ;;  %v349_v8 = vpop.f32.mrf.mxu1  ;;  %1987 = vmatprep.subr.mxu1 %v2354_v43 }
 0x14d   :  { %525 = vmatprep.mubr.f32.mxu0 %v365_v5  ;;  %610 = vmatprep.mubr.f32.mxu1 %v367_v60  ;;  %v368_v14 = vmul.f32 %v260_v7, %v162_v11  ;;  %v370_v1 = vmul.f32 %v349_v8, %v164_v6 }
 0x14e   :  { %v262_v34 = vpop.f32.mrf.mxu0  ;;  %v351_v12 = vpop.f32.mrf.mxu1  ;;  %526 = vmatmul.mubr.f32.gmra.mxu0 %v364_v61  ;;  %611 = vmatmul.mubr.f32.gmra.mxu1 %v366_v0 }
 0x14f   :  { %v369_v48 = vmul.f32 %v262_v34, %v163_v9  ;;  %v371_v56 = vmul.f32 %v351_v12, %v165_v10  ;;  %1988 = vmatpush3.msra.mxu1 %v2354_v43 }
 0x150   :  { %v266_v15 = vpop.f32.mrf.mxu0  ;;  %v355_v16 = vpop.f32.mrf.mxu1  ;;  %1989 = vmatprep.subr.mxu1 %v2361_v45 }
 0x151   :  { %530 = vmatprep.mubr.f32.mxu0 %v369_v48  ;;  %615 = vmatprep.mubr.f32.mxu1 %v371_v56  ;;  %v372_v26 = vmul.f32 %v266_v15, %v166_v18  ;;  %v374_v28 = vmul.f32 %v355_v16, %v168_v19  ;;  %v632_v18 = vld [vmem:[%s2927_s5 + $0x30] sm:$0xff]  ;;  %v633_v19 = vld [vmem:[%s2927_s5 + $0x38] sm:$0xff] }
 0x152   :  { %v268_v22 = vpop.f32.mrf.mxu0  ;;  %v357_v23 = vpop.f32.mrf.mxu1  ;;  %531 = vmatmul.mubr.f32.gmra.mxu0 %v368_v14  ;;  %616 = vmatmul.mubr.f32.gmra.mxu1 %v370_v1 }
 0x153   :  { %v373_v24 = vmul.f32 %v268_v22, %v167_v2  ;;  %v375_v25 = vmul.f32 %v357_v23, %v169_v17  ;;  %1990 = vmatpush3.msra.mxu1 %v2361_v45  ;;  %v631_v17 = vld [vmem:[%s2927_s5 + $0x28] sm:$0xff]  ;;  %v634_v22 = vld [vmem:[%s2927_s5 + $0x40] sm:$0xff] }
 0x154   :  { %1991 = vmatprep.subr.mxu1 %v2366_v46  ;;  %v635_v23 = vld [vmem:[%s2927_s5 + $0x48] sm:$0xff] }
 0x155   :  { %535 = vmatprep.mubr.f32.mxu0 %v373_v24  ;;  %620 = vmatprep.mubr.f32.mxu1 %v375_v25  ;;  %v636_v24 = vld [vmem:[%s2927_s5 + $0x50] sm:$0xff]  ;;  %v637_v25 = vld [vmem:[%s2927_s5 + $0x58] sm:$0xff] }
 0x156   :  { %536 = vmatmul.mubr.f32.gmra.mxu0 %v372_v26  ;;  %621 = vmatmul.mubr.f32.gmra.mxu1 %v374_v28 }
 0x157   :  { %1992 = vmatpush3.msra.mxu1 %v2366_v46  ;;  %1967 = vmatprep.mubr.msk.f32.mxu0 %vm46_vm0, %v626_v3 }
 0x158   :  { %1999 = vmatprep.subr.mxu1 %v2522_v13 }
 0x20a   :  { %v1827_v29 = vpop.f32.mrf.mxu0  ;;  %v1871_v32 = vpop.f32.mrf.mxu1 }
 0x20c   :  { %v1828_v33 = vpop.f32.mrf.mxu0  ;;  %v1872_v35 = vpop.f32.mrf.mxu1 }
 0x20d   :  { %v1829_v9 = vadd.f32 %v1828_v33, %v1827_v29  ;;  %v1873_v15 = vadd.f32 %v1872_v35, %v1871_v32 }
 0x20e   :  { %v1830_v36 = vpop.f32.mrf.mxu0  ;;  %v1874_v37 = vpop.f32.mrf.mxu1 }
 0x20f   :  { %v523_v56 = vadd.f32 %v1829_v9, %v2496_v63  ;;  %v630_v63 = vld [vmem:[%s2927_s5 + $0x20] sm:$0xff] }
 0x210   :  { %v1831_v38 = vpop.f32.mrf.mxu0  ;;  %v1875_v40 = vpop.f32.mrf.mxu1 }
 0x211   :  { %v1832_v7 = vadd.f32 %v1831_v38, %v1830_v36  ;;  %v1876_v14 = vadd.f32 %v1875_v40, %v1874_v37  ;;  %v608_v2 = vadd.f32 %v1873_v15, %v523_v56  ;;  %v639_v56 = vld [vmem:[%s2927_s5 + $0x68] sm:$0xff] }
 0x212   :  { %v1833_v41 = vpop.f32.mrf.mxu0  ;;  %v1877_v53 = vpop.f32.mrf.mxu1 }
 0x213   :  { %v528_v34 = vadd.f32 %v1832_v7, %v2494_v62  ;;  %v629_v62 = vld [vmem:[%s2927_s5 + $0x18] sm:$0xff] }
 0x214   :  { %v1834_v57 = vpop.f32.mrf.mxu0  ;;  %v1878_v58 = vpop.f32.mrf.mxu1 }
 0x215   :  { %v1835_v60 = vadd.f32 %v1834_v57, %v1833_v41  ;;  %v1879_v12 = vadd.f32 %v1878_v58, %v1877_v53  ;;  %v613_v16 = vadd.f32 %v1876_v14, %v528_v34  ;;  %v644_v14 = vld [vmem:[%s2927_s5 + $0x90] sm:$0xff] }
 0x216   :  { %v1836_v59 = vpop.f32.mrf.mxu0  ;;  %v1880_v5 = vpop.f32.mrf.mxu1 }
 0x217   :  { %v533_v10 = vadd.f32 %v1835_v60, %v2466_v55  ;;  %v628_v55 = vld [vmem:[%s2927_s5 + $0x10] sm:$0xff] }
 0x218   :  { %v1837_v61 = vpop.f32.mrf.mxu0  ;;  %v1881_v0 = vpop.f32.mrf.mxu1 }
 0x219   :  { %v1838_v8 = vadd.f32 %v1837_v61, %v1836_v59  ;;  %v1882_v6 = vadd.f32 %v1881_v0, %v1880_v5  ;;  %v618_v1 = vadd.f32 %v1879_v12, %v533_v10 }
 0x21b   :  { %v538_v11 = vadd.f32 %v1838_v8, %v2464_v54  ;;  %v627_v54 = vld [vmem:[%s2927_s5 + $0x8] sm:$0xff] }
 0x21d   :  { %v623_v48 = vadd.f32 %v1882_v6, %v538_v11 }
 0x21f   :  { %1959 = vmatprep.subr.mxu0 %v623_v48 }
 0x220   :  { %1960 = vmatpush3.msra.mxu0 %v623_v48 }
 0x221   :  { %1961 = vmatprep.subr.mxu0 %v618_v1 }
 0x222   :  { %1962 = vmatpush3.msra.mxu0 %v618_v1  ;;  %v645_v1 = vld [vmem:[%s2927_s5 + $0x98] sm:$0xff] }
 0x223   :  { %1963 = vmatprep.subr.mxu0 %v613_v16 }
 0x224   :  { %1964 = vmatpush3.msra.mxu0 %v613_v16 }
 0x225   :  { %1965 = vmatprep.subr.mxu0 %v608_v2 }
 0x226   :  { %1966 = vmatpush3.msra.mxu0 %v608_v2 }
 0x227   :  { %1968 = vmatmul.mubr.msk.f32.vlgmr.msra.gmra.mxu0 %vm46_vm0, %v627_v54 }
 0x228   :  { %1970 = vmatprep.mubr.msk.f32.mxu0 %vm46_vm0, %v628_v55 }
 0x22b   :  { %1971 = vmatmul.mubr.msk.f32.gmra.mxu0 %vm46_vm0, %v629_v62 }
 0x22c   :  { %1973 = vmatprep.mubr.msk.f32.mxu0 %vm46_vm0, %v630_v63 }
 0x22f   :  { %1974 = vmatmul.mubr.msk.f32.gmra.mxu0 %vm46_vm0, %v631_v17 }
 0x230   :  { %1976 = vmatprep.mubr.msk.f32.mxu0 %vm46_vm0, %v632_v18 }
 0x233   :  { %1977 = vmatmul.mubr.msk.f32.gmra.mxu0 %vm46_vm0, %v633_v19 }
 0x234   :  { %1979 = vmatprep.mubr.msk.f32.mxu0 %vm46_vm0, %v634_v22 }
 0x237   :  { %1980 = vmatmul.mubr.msk.f32.gmra.mxu0 %vm46_vm0, %v635_v23  ;;  %v1261_v23 = vrot.slane %v2626_v27, 4 }
 0x238   :  { %1982 = vmatprep.mubr.msk.f32.mxu0 %vm46_vm0, %v636_v24  ;;  %v1055_v24 = vpop.permute.xlu1 %1054 }
 0x23b   :  { %1983 = vmatmul.mubr.msk.f32.gmra.mxu0 %vm46_vm0, %v637_v25 }
 0x23c   :  { %2041 = vmatprep.mubr.msk.f32.mxu0 %vm46_vm0, %v2341_v39 }
 0x2e7   :  { %v1969_v26 = vpop.f32.mrf.mxu0 }
 0x2e9   :  { %v748_v28 = vpop.f32.mrf.mxu0 }
 0x2ea   :  { %1993 = vmatprep.mubr.msk.f32.mxu1 %vm46_vm0, %v748_v28 }
 0x2eb   :  { %v1972_v3 = vpop.f32.mrf.mxu0  ;;  %1994 = vmatmul.mubr.msk.f32.vlgmr.msra.gmra.mxu1 %vm46_vm0, %v1969_v26 }
 0x2ec   :  { %2000 = vmatpush3.msra.mxu1 %v2522_v13 }
 0x2ed   :  { %v758_v29 = vpop.f32.mrf.mxu0  ;;  %2001 = vmatprep.subr.mxu1 %v2524_v4 }
 0x2ee   :  { %1996 = vmatprep.mubr.msk.f32.mxu1 %vm46_vm0, %v758_v29  ;;  %2002 = vmatpush3.msra.mxu1 %v2524_v4 }
 0x2ef   :  { %v1975_v32 = vpop.f32.mrf.mxu0  ;;  %1997 = vmatmul.mubr.msk.f32.gmra.mxu1 %vm46_vm0, %v1972_v3  ;;  %2003 = vmatprep.subr.mxu1 %v2550_v20 }
 0x2f0   :  { %2004 = vmatpush3.msra.mxu1 %v2550_v20  ;;  %v638_v20 = vld [vmem:[%s2927_s5 + $0x60] sm:$0xff] }
 0x2f1   :  { %v768_v33 = vpop.f32.mrf.mxu0  ;;  %2005 = vmatprep.subr.mxu1 %v2552_v21 }
 0x2f2   :  { %2006 = vmatpush3.msra.mxu1 %v2552_v21 }
 0x2f3   :  { %v1978_v13 = vpop.f32.mrf.mxu0 }
 0x2f5   :  { %v778_v35 = vpop.f32.mrf.mxu0 }
 0x2f7   :  { %v1981_v36 = vpop.f32.mrf.mxu0 }
 0x2f9   :  { %v788_v37 = vpop.f32.mrf.mxu0 }
 0x2fa   :  { %2007 = vmatprep.mubr.msk.f32.mxu1 %vm46_vm0, %v788_v37 }
 0x2fb   :  { %v1984_v38 = vpop.f32.mrf.mxu0  ;;  %2008 = vmatmul.mubr.msk.f32.vlgmr.msra.gmra.mxu1 %vm46_vm0, %v1981_v36  ;;  %v1051_v36 = vpop.permute.xlu0 %1050 }
 0x2fd   :  { %v798_v4 = vpop.f32.mrf.mxu0 }
 0x2fe   :  { %2010 = vmatprep.mubr.msk.f32.mxu1 %vm46_vm0, %v798_v4 }
 0x2ff   :  { %2011 = vmatmul.mubr.msk.f32.gmra.mxu1 %vm46_vm0, %v1984_v38 }
 0x300   :  { %2021 = vmatprep.mubr.msk.f32.mxu1 %vm46_vm0, %v638_v20 }
 0x3ab   :  { %v1995_v21 = vpop.f32.mrf.mxu1 }
 0x3ac   :  { %v891_v60 = vadd.f32 %v1995_v21, %v1975_v32 }
 0x3ad   :  { %v885_v40 = vpop.f32.mrf.mxu1 }
 0x3ae   :  { %v886_v8 = vadd.f32 %v885_v40, %v768_v33  ;;  %v1281_v33 = vpop.permute.xlu1 %1280  ;;  %v1277_v40 = vpop.permute.xlu0 %1276 }
 0x3af   :  { %v1998_v41 = vpop.f32.mrf.mxu1 }
 0x3b0   :  { %v901_v59 = vadd.f32 %v1998_v41, %v1978_v13 }
 0x3b1   :  { %v895_v53 = vpop.f32.mrf.mxu1 }
 0x3b2   :  { %v896_v61 = vadd.f32 %v895_v53, %v778_v35  ;;  %v1047_v35 = vpop.permute.xlu1 %1046 }
 0x3b6   :  { %v1043_v20 = vpop.permute.xlu1 %1042 }
 0x3bb   :  { %v2009_v57 = vpop.f32.mrf.mxu1 }
 0x3bc   :  { %v1018_v9 = vadd.f32 %v2009_v57, %v891_v60 }
 0x3bd   :  { %v998_v58 = vpop.f32.mrf.mxu1 }
 0x3be   :  { %v1017_v6 = vadd.f32 %v998_v58, %v886_v8  ;;  %v1038_v12 = vadd.f32 %v2606_v44, %v1018_v9  ;;  %v642_v44 = vld [vmem:[%s2927_s5 + $0x80] sm:$0xff]  ;;  %v1273_v9 = vpop.permute.xlu1 %1272 }
 0x3bf   :  { %v2012_v5 = vpop.f32.mrf.mxu1 }
 0x3c0   :  { %v1020_v0 = vadd.f32 %v2012_v5, %v901_v59  ;;  %v1037_v48 = vadd.f32 %v2608_v47, %v1017_v6  ;;  %v643_v47 = vld [vmem:[%s2927_s5 + $0x88] sm:$0xff] }
 0x3c1   :  { %v1008_v7 = vpop.f32.mrf.mxu1 }
 0x3c2   :  { %v1040_v10 = vadd.f32 %v2578_v30, %v1020_v0  ;;  %v1019_v11 = vadd.f32 %v1008_v7, %v896_v61  ;;  %v640_v30 = vld [vmem:[%s2927_s5 + $0x70] sm:$0xff] }
 0x3c4   :  { %v1039_v34 = vadd.f32 %v2580_v31, %v1019_v11  ;;  %2013 = vmatprep.subr.mxu1 %v1040_v10  ;;  %v641_v31 = vld [vmem:[%s2927_s5 + $0x78] sm:$0xff] }
 0x3c5   :  { %2014 = vmatpush3.msra.mxu1 %v1040_v10 }
 0x3c6   :  { %2015 = vmatprep.subr.mxu1 %v1039_v34 }
 0x3c7   :  { %2016 = vmatpush3.msra.mxu1 %v1039_v34 }
 0x3c8   :  { %2017 = vmatprep.subr.mxu1 %v1038_v12 }
 0x3c9   :  { %2018 = vmatpush3.msra.mxu1 %v1038_v12  ;;  %v1269_v12 = vpop.permute.xlu0 %1268 }
 0x3ca   :  { %2019 = vmatprep.subr.mxu1 %v1037_v48 }
 0x3cb   :  { %2020 = vmatpush3.msra.mxu1 %v1037_v48 }
 0x3cc   :  { %2022 = vmatmul.mubr.msk.f32.vlgmr.msra.gmra.mxu1 %vm46_vm0, %v639_v56 }
 0x3cd   :  { %2024 = vmatprep.mubr.msk.f32.mxu1 %vm46_vm0, %v640_v30 }
 0x3d0   :  { %2025 = vmatmul.mubr.msk.f32.gmra.mxu1 %vm46_vm0, %v641_v31 }
 0x3d1   :  { %2027 = vmatprep.mubr.msk.f32.mxu1 %vm46_vm0, %v642_v44 }
 0x3d4   :  { %2028 = vmatmul.mubr.msk.f32.gmra.mxu1 %vm46_vm0, %v643_v47  ;;  %v1391_v47 = vpop.permute.xlu1 %1390 }
 0x3d5   :  { %2030 = vmatprep.mubr.msk.f32.mxu1 %vm46_vm0, %v644_v14 }
 0x3d8   :  { %2031 = vmatmul.mubr.msk.f32.gmra.mxu1 %vm46_vm0, %v645_v1  ;;  %v1389_v1 = vpop.permute.xlu0 %1388 }
 0x3d9   :  { %2069 = vmatprep.mubr.msk.f32.mxu1 %vm46_vm0, %v2341_v39 }
 0x48c   :  { %v2023_v15 = vpop.f32.mrf.mxu1 }
 0x48d   :  { %v1169_v5 = vadd.f32 %v2023_v15, %v1047_v35  ;;  %v2147_v15 = vld [vmem:[%s2924_s4 + $0x8] sm:$0xff] }
 0x48e   :  { %v1163_v16 = vpop.f32.mrf.mxu1 }
 0x48f   :  { %v1164_v10 = vadd.f32 %v1163_v16, %v1043_v20  ;;  %v2148_v16 = vld [vmem:[%s2924_s4 + $0x10] sm:$0xff] }
 0x490   :  { %v2026_v2 = vpop.f32.mrf.mxu1 }
 0x491   :  { %v1179_v41 = vadd.f32 %v2026_v2, %v1055_v24  ;;  %v1387_v2 = vpop.permute.xlu1 %1386 }
 0x492   :  { %v1173_v54 = vpop.f32.mrf.mxu1 }
 0x493   :  { %v1174_v60 = vadd.f32 %v1173_v54, %v1051_v36  ;;  %v1385_v54 = vpop.permute.xlu0 %1384 }
 0x494   :  { %v2029_v55 = vpop.f32.mrf.mxu1 }
 0x495   :  { %v1189_v62 = vadd.f32 %v2029_v55, %v2614_v51  ;;  %v2149_v55 = vld [vmem:[%s2924_s4 + $0x18] sm:$0xff] }
 0x496   :  { %v1183_v63 = vpop.f32.mrf.mxu1 }
 0x497   :  { %v1776_v17 = vmul.f32 -1.442695, %v1189_v62  ;;  %v1184_v39 = vadd.f32 %v1183_v63, %v2616_v52  ;;  %v1262_v52 = vadd.f32 %v1261_v23, %v2626_v27 }
 0x498   :  { %v2032_v18 = vpop.f32.mrf.mxu1 }
 0x499   :  { %2123 = vpow2.f32 %v1776_v17  ;;  %v1775_v42 = vmul.f32 -1.442695, %v1184_v39  ;;  %v1199_v43 = vadd.f32 %v2032_v18, %v2610_v49  ;;  %v1263_v32 = vrot.slane %v1262_v52, 2 }
 0x49a   :  { %v1193_v19 = vpop.f32.mrf.mxu1 }
 0x49b   :  { %2125 = vpow2.f32 %v1775_v42  ;;  %v1778_v45 = vmul.f32 -1.442695, %v1199_v43  ;;  %v1194_v46 = vadd.f32 %v1193_v19, %v2612_v50  ;;  %v1264_v13 = vadd.f32 %v1263_v32, %v1262_v52  ;;  %v2154_v32 = vld [vmem:[%s2921_s6 + $0x18] sm:$0xff] }
 0x49c   :  { %v2165_v52 = vmov 2  }
 0x49d   :  { %2127 = vpow2.f32 %v1778_v45  ;;  %v1777_v22 = vmul.f32 -1.442695, %v1194_v46  ;;  %v1265_v37 = vrot.slane %v1264_v13, 1  ;;  %2119 = vset.pattern.permute.xlu1 %v2165_v52  ;;  %2120 = vset.pattern.permute.xlu0 %v2165_v52 }
 0x49f   :  { %2129 = vpow2.f32 %v1777_v22  ;;  %v1266_v4 = vadd.f32 %v1265_v37, %v1264_v13  ;;  %v2157_v13 = vld [vmem:[%s2921_s6 + $0x38] sm:$0xff] }
 0x4a1   :  { %v1286_v59 = vmul.f32 %v1281_v33, %v1266_v4  ;;  %v1285_v8 = vmul.f32 %v1277_v40, %v1266_v4  ;;  %v1284_v48 = vmul.f32 %v1273_v9, %v1266_v4  ;;  %v1283_v31 = vmul.f32 %v1269_v12, %v1266_v4  ;;  %v2155_v33 = vld [vmem:[%s2921_s6 + $0x30] sm:$0xff] }
 0x4a6   :  { %v2124_v51 = vpop.eup %2123 }
 0x4a7   :  { %v1215_v25 = vadd.f32 1.0, %v2124_v51 }
 0x4a8   :  { %v2126_v26 = vpop.eup %2125 }
 0x4a9   :  { %v1214_v28 = vadd.f32 1.0, %v2126_v26  ;;  %2131 = vrcp.f32 %v1215_v25 }
 0x4aa   :  { %v2128_v3 = vpop.eup %2127 }
 0x4ab   :  { %v1217_v49 = vadd.f32 1.0, %v2128_v3  ;;  %2133 = vrcp.f32 %v1214_v28  ;;  %v2150_v28 = vld [vmem:[%s2921_s6] sm:$0xff]  ;;  %v2151_v3 = vld [vmem:[%s2921_s6 + $0x8] sm:$0xff] }
 0x4ac   :  { %v2130_v29 = vpop.eup %2129  ;;  %1692 = vperm.xlu1 %2119, %v2150_v28   ;;  %1696 = vperm.xlu0 %2120, %v2151_v3  }
 0x4ad   :  { %2135 = vrcp.f32 %v1217_v49  ;;  %v1216_v50 = vadd.f32 1.0, %v2130_v29  ;;  %v2152_v49 = vld [vmem:[%s2921_s6 + $0x10] sm:$0xff]  ;;  %v2153_v29 = vld [vmem:[%s2921_s6 + $0x20] sm:$0xff] }
 0x4af   :  { %2137 = vrcp.f32 %v1216_v50  ;;  %v2156_v50 = vld [vmem:[%s2921_s6 + $0x28] sm:$0xff] }
 0x4b0   :  { %1700 = vperm.xlu1 %2119, %v2152_v49   ;;  %1712 = vperm.xlu0 %2120, %v2153_v29  }
 0x4b4   :  { %1704 = vperm.xlu1 %2119, %v2154_v32   ;;  %1720 = vperm.xlu0 %2120, %v2155_v33  }
 0x4b6   :  { %v2132_v38 = vpop.eup %2131 }
 0x4b7   :  { %v1227_v53 = vmul.f32 %v2132_v38, %v1189_v62 }
 0x4b8   :  { %v2134_v21 = vpop.eup %2133  ;;  %1716 = vperm.xlu1 %2119, %v2156_v50  }
 0x4b9   :  { %v1226_v61 = vmul.f32 %v2134_v21, %v1184_v39  ;;  %v1231_v11 = vmul.f32 %v1227_v53, %v1169_v5 }
 0x4ba   :  { %v2136_v27 = vpop.eup %2135 }
 0x4bb   :  { %v1229_v57 = vmul.f32 %v2136_v27, %v1199_v43  ;;  %v1230_v56 = vmul.f32 %v1226_v61, %v1164_v10  ;;  %v1288_v44 = vadd.f32 %v1284_v48, %v1231_v11 }
 0x4bc   :  { %v2138_v58 = vpop.eup %2137  ;;  %1724 = vperm.xlu1 %2119, %v2157_v13  }
 0x4bd   :  { %v1233_v0 = vmul.f32 %v1229_v57, %v1179_v41  ;;  %v1228_v7 = vmul.f32 %v2138_v58, %v1194_v46  ;;  %v1287_v14 = vadd.f32 %v1283_v31, %v1230_v56 }
 0x4bf   :  { %v1232_v6 = vmul.f32 %v1228_v7, %v1174_v60  ;;  %v1290_v34 = vadd.f32 %v1286_v59, %v1233_v0 }
 0x4c1   :  { %2033 = vmatprep.subr.mxu0 %v1290_v34  ;;  %v1289_v30 = vadd.f32 %v1285_v8, %v1232_v6 }
 0x4c2   :  { %2034 = vmatpush3.msra.mxu0 %v1290_v34 }
 0x4c3   :  { %2035 = vmatprep.subr.mxu0 %v1289_v30 }
 0x4c4   :  { %2036 = vmatpush3.msra.mxu0 %v1289_v30 }
 0x4c5   :  { %2037 = vmatprep.subr.mxu0 %v1288_v44 }
 0x4c6   :  { %2038 = vmatpush3.msra.mxu0 %v1288_v44 }
 0x4c7   :  { %2039 = vmatprep.subr.mxu0 %v1287_v14 }
 0x4c8   :  { %2040 = vmatpush3.msra.mxu0 %v1287_v14 }
 0x4c9   :  { %2042 = vmatmul.mubr.msk.f32.vlgmr.msra.gmra.mxu0 %vm46_vm0, %v2147_v15  ;;  %2047 = vmatprep.subr.mxu0 %v1391_v47 }
 0x4ca   :  { %2044 = vmatprep.mubr.msk.f32.mxu0 %vm46_vm0, %v2148_v16  ;;  %2048 = vmatpush3.msra.mxu0 %v1391_v47 }
 0x4cb   :  { %2049 = vmatprep.subr.mxu0 %v1389_v1 }
 0x4cc   :  { %2050 = vmatpush3.msra.mxu0 %v1389_v1 }
 0x4cd   :  { %2045 = vmatmul.mubr.msk.f32.gmra.mxu0 %vm46_vm0, %v2149_v55  ;;  %2051 = vmatprep.subr.mxu0 %v1387_v2 }
 0x4ce   :  { %2052 = vmatpush3.msra.mxu0 %v1387_v2 }
 0x4cf   :  { %2053 = vmatprep.subr.mxu0 %v1385_v54 }
 0x4d0   :  { %2054 = vmatpush3.msra.mxu0 %v1385_v54 }
 0x4d1   :  { %2075 = vmatprep.subr.mxu0 %v1391_v47 }
 0x527   :  { %v1693_v20 = vpop.permute.xlu1 %1692  ;;  %v1697_v60 = vpop.permute.xlu0 %1696 }
 0x52b   :  { %v1701_v58 = vpop.permute.xlu1 %1700  ;;  %v1713_v6 = vpop.permute.xlu0 %1712 }
 0x52f   :  { %v1705_v5 = vpop.permute.xlu1 %1704 }
 0x533   :  { %v1717_v8 = vpop.permute.xlu1 %1716 }
 0x589   :  { %v2043_v62 = vpop.f32.mrf.mxu0 }
 0x58b   :  { %v1365_v63 = vpop.f32.mrf.mxu0 }
 0x58c   :  { %2055 = vmatprep.mubr.msk.f32.mxu0 %vm46_vm0, %v1365_v63 }
 0x58d   :  { %v2046_v17 = vpop.f32.mrf.mxu0  ;;  %2056 = vmatmul.mubr.msk.f32.vlgmr.msra.gmra.mxu0 %vm46_vm0, %v2043_v62 }
 0x58e   :  { %2076 = vmatpush3.msra.mxu0 %v1391_v47 }
 0x58f   :  { %2077 = vmatprep.subr.mxu0 %v1389_v1  ;;  %v1375_v39 = vpop.f32.mrf.mxu0 }
 0x590   :  { %2078 = vmatpush3.msra.mxu0 %v1389_v1  ;;  %2058 = vmatprep.mubr.msk.f32.mxu0 %vm46_vm0, %v1375_v39 }
 0x591   :  { %2079 = vmatprep.subr.mxu0 %v1387_v2  ;;  %2059 = vmatmul.mubr.msk.f32.gmra.mxu0 %vm46_vm0, %v2046_v17 }
 0x592   :  { %2080 = vmatpush3.msra.mxu0 %v1387_v2 }
 0x593   :  { %2081 = vmatprep.subr.mxu0 %v1385_v54 }
 0x594   :  { %2082 = vmatpush3.msra.mxu0 %v1385_v54 }
 0x64d   :  { %v2057_v18 = vpop.f32.mrf.mxu0 }
 0x64e   :  { %v2856_v46 = vsub.f32 %v1288_v44, %v2057_v18 }
 0x64f   :  { %v1474_v42 = vpop.f32.mrf.mxu0 }
 0x650   :  { %v2862_v51 = vsub.f32 %v1287_v14, %v1474_v42  ;;  %v1498_v25 = vmul.f32 %v2856_v46, %v2856_v46 }
 0x651   :  { %v2060_v43 = vpop.f32.mrf.mxu0 }
 0x652   :  { %v2854_v19 = vsub.f32 %v1290_v34, %v2060_v43  ;;  %v1497_v26 = vmul.f32 %v2862_v51, %v2862_v51 }
 0x653   :  { %v1484_v45 = vpop.f32.mrf.mxu0 }
 0x654   :  { %v1500_v22 = vmul.f32 %v2854_v19, %v2854_v19  ;;  %v2860_v23 = vsub.f32 %v1289_v30, %v1484_v45 }
 0x656   :  { %v1499_v24 = vmul.f32 %v2860_v23, %v2860_v23  ;;  %2061 = vmatprep.subr.mxu1 %v1500_v22 }
 0x657   :  { %2062 = vmatpush3.msra.mxu1 %v1500_v22 }
 0x658   :  { %2063 = vmatprep.subr.mxu1 %v1499_v24 }
 0x659   :  { %2064 = vmatpush3.msra.mxu1 %v1499_v24 }
 0x65a   :  { %2065 = vmatprep.subr.mxu1 %v1498_v25 }
 0x65b   :  { %2066 = vmatpush3.msra.mxu1 %v1498_v25 }
 0x65c   :  { %2067 = vmatprep.subr.mxu1 %v1497_v26 }
 0x65d   :  { %2068 = vmatpush3.msra.mxu1 %v1497_v26 }
 0x65e   :  { %2070 = vmatmul.mubr.msk.f32.vlgmr.msra.gmra.mxu1 %vm46_vm0, %v2147_v15  ;;  %2089 = vmatprep.subr.mxu1 %v1391_v47  ;;  %v1721_v15 = vpop.permute.xlu0 %1720 }
 0x65f   :  { %2093 = vmatpush3.msra.mxu1 %v1391_v47  ;;  %2072 = vmatprep.mubr.msk.f32.mxu1 %vm46_vm0, %v2148_v16  ;;  %v1725_v47 = vpop.permute.xlu1 %1724 }
 0x660   :  { %2090 = vmatprep.subr.mxu1 %v1389_v1 }
 0x661   :  { %2094 = vmatpush3.msra.mxu1 %v1389_v1 }
 0x662   :  { %2073 = vmatmul.mubr.msk.f32.gmra.mxu1 %vm46_vm0, %v2149_v55  ;;  %2091 = vmatprep.subr.mxu1 %v1387_v2 }
 0x663   :  { %2095 = vmatpush3.msra.mxu1 %v1387_v2 }
 0x664   :  { %2092 = vmatprep.subr.mxu1 %v1385_v54 }
 0x665   :  { %2096 = vmatpush3.msra.mxu1 %v1385_v54 }
 0x71e   :  { %v2071_v35 = vpop.f32.mrf.mxu1 }
 0x720   :  { %v1567_v36 = vpop.f32.mrf.mxu1 }
 0x721   :  { %2083 = vmatprep.mubr.msk.f32.mxu0 %vm46_vm0, %v1567_v36 }
 0x722   :  { %v2074_v37 = vpop.f32.mrf.mxu1  ;;  %2084 = vmatmul.mubr.msk.f32.vlgmr.msra.gmra.mxu0 %vm46_vm0, %v2071_v35 }
 0x724   :  { %v1577_v38 = vpop.f32.mrf.mxu1 }
 0x725   :  { %2086 = vmatprep.mubr.msk.f32.mxu1 %vm46_vm0, %v1577_v38 }
 0x726   :  { %2087 = vmatmul.mubr.msk.f32.vlgmr.msra.gmra.mxu1 %vm46_vm0, %v2074_v37 }
 0x7e2   :  { %v2085_v4 = vpop.f32.mrf.mxu0 }
 0x7e3   :  { %v1670_v21 = vadd.f32 1e-05, %v2085_v4 }
 0x7e4   :  { %v1664_v27 = vpop.f32.mrf.mxu0 }
 0x7e5   :  { %2139 = vrsqrt.f32 %v1670_v21  ;;  %v1665_v40 = vadd.f32 1e-05, %v1664_v27 }
 0x7e6   :  { %v2088_v41 = vpop.f32.mrf.mxu1 }
 0x7e7   :  { %2141 = vrsqrt.f32 %v1665_v40  ;;  %v1680_v53 = vadd.f32 1e-05, %v2088_v41 }
 0x7e8   :  { %v1674_v57 = vpop.f32.mrf.mxu1 }
 0x7e9   :  { %2143 = vrsqrt.f32 %v1680_v53  ;;  %v1675_v59 = vadd.f32 1e-05, %v1674_v57 }
 0x7eb   :  { %2145 = vrsqrt.f32 %v1675_v59 }
 0x7f2   :  { %v2140_v61 = vpop.eup %2139 }
 0x7f3   :  { %v1688_v0 = vmul.f32 %v2140_v61, %v2856_v46 }
 0x7f4   :  { %v2142_v7 = vpop.eup %2141 }
 0x7f5   :  { %v1687_v9 = vmul.f32 %v2142_v7, %v2862_v51  ;;  %v1708_v10 = vmul.f32 %v1697_v60, %v1688_v0 }
 0x7f6   :  { %v2144_v11 = vpop.eup %2143 }
 0x7f7   :  { %v1707_v34 = vmul.f32 %v1693_v20, %v1687_v9  ;;  %v1690_v12 = vmul.f32 %v2144_v11, %v2854_v19  ;;  %v1728_v48 = vadd.f32 %v1717_v8, %v1708_v10 }
 0x7f8   :  { %v2146_v56 = vpop.eup %2145 }
 0x7f9   :  { %v1689_v30 = vmul.f32 %v2146_v56, %v2860_v23  ;;  %v1710_v31 = vmul.f32 %v1705_v5, %v1690_v12  ;;  %1732 = vst.msk [vmem:[%s2928_s7 + $0x8] sm:$0xff] %vm46_vm0, %v1728_v48  ;;  %v1727_v44 = vadd.f32 %v1713_v6, %v1707_v34 }
 0x7fb   :  { %v1709_v14 = vmul.f32 %v1701_v58, %v1689_v30  ;;  %1731 = vst.msk [vmem:[%s2928_s7] sm:$0xff] %vm46_vm0, %v1727_v44  ;;  %v1730_v1 = vadd.f32 %v1725_v47, %v1710_v31 }
 0x7fd   :  { %1734 = vst.msk [vmem:[%s2928_s7 + $0x18] sm:$0xff] %vm46_vm0, %v1730_v1  ;;  %v1729_v16 = vadd.f32 %v1721_v15, %v1709_v14 }
 0x7ff   :  { %1733 = vst.msk [vmem:[%s2928_s7 + $0x10] sm:$0xff] %vm46_vm0, %v1729_v16 }

</bundles_post_ra>
